<compile_context>
chip_gen: v6e
topology: v6e:2x2x1
jax: 0.10.0
libtpu: 0.0.40
codegen_flags: <defaults>
</compile_context>

<pallas_src>
import jax
import jax.numpy as jnp
from jax import lax
from jax.experimental import pallas as pl
from jax.experimental.pallas import tpu as pltpu


def _leaky_relu(x, slope=0.01):
    return jnp.where(x >= 0, x, slope * x)


def _pick_b_tile(B):
    """Batch tile for the leading parallel grid axis (multiple-of-8 when useful)."""
    for t in (128, 64, 32, 16, 8):
        if B % t == 0 and B // t >= 2:
            return t
    return B


def _make_kernel(S, T_CHUNK, H, H2, unroll, need_valid_mask, slice_gates):
    """Kernel closure with static sequence/chunk/size constants."""

    def kernel(xg_ref, w_hh_ref, w_skip_ref, bg_ref, wso_ref, wto_ref, bgo_ref,
               out_ref, cfin_ref, h_sc, c_sc, cum_sc):
        chunk = pl.program_id(1)

        # First chunk of every batch block: zero-init h/c, cum starts at 1
        # (matches `input.new_ones(batch, 1)`).
        @pl.when(chunk == 0)
        def _():
            h_sc[...] = jnp.zeros_like(h_sc)
            c_sc[...] = jnp.zeros_like(c_sc)
            cum_sc[...] = jnp.ones_like(cum_sc)

        B = h_sc.shape[0]

        # Hoist weight loads and bias/vector broadcasts out of the time loop
        # (JAX does not CSE broadcast_in_dim inside the loop body).
        w_hh = w_hh_ref[...]                                          # (H, 4H)
        w_skip = w_skip_ref[...]                                      # (2H, 2*H2)
        bg_b = jnp.broadcast_to(bg_ref[...], (B, 2 * H2))             # (B, 2*H2)
        wso_b = jnp.broadcast_to(wso_ref[...], (B, H2))               # (B, H2)
        wto_b = jnp.broadcast_to(wto_ref[...], (B, H2))               # (B, H2)
        bgo_b = jnp.broadcast_to(bgo_ref[...], (B, 2))                # (B, 2)
        bso_b = bgo_b[:, 0:1]
        bto_b = bgo_b[:, 1:2]

        def step(t, carry):
            h0, c0, cum = carry
            xg = xg_ref[t]                                            # (B, 4H): x-proj + both LSTM biases

            # ---- LSTM cell (PyTorch gate order i, f, g, o); only recurrent matmul here ----
            gates = xg + jnp.dot(h0, w_hh, preferred_element_type=jnp.float32)   # (B, 4H)
            if slice_gates:
                # lane-aligned quarters: sigmoid only on i/f/o, tanh only on g (half the EUP work)
                i_g = jax.nn.sigmoid(gates[:, 0 * H:1 * H])
                f_g = jax.nn.sigmoid(gates[:, 1 * H:2 * H])
                g_g = jnp.tanh(gates[:, 2 * H:3 * H])
                o_g = jax.nn.sigmoid(gates[:, 3 * H:4 * H])
            else:
                # small H: full-width EUP passes avoid sub-vreg lane shuffles
                sig = jax.nn.sigmoid(gates)
                tnh = jnp.tanh(gates)
                i_g = sig[:, 0 * H:1 * H]
                f_g = sig[:, 1 * H:2 * H]
                g_g = tnh[:, 2 * H:3 * H]
                o_g = sig[:, 3 * H:4 * H]
            c1 = f_g * c0 + i_g * g_g
            h1 = o_g * jnp.tanh(c1)

            # ---- fused skip-gate + threshold-gate inner layer: ONE MXU push ----
            cc = jnp.concatenate([c0, c1], axis=-1)                   # (B, 2H)
            gt = _leaky_relu(
                jnp.dot(cc, w_skip, preferred_element_type=jnp.float32) + bg_b)  # (B, 2*H2) = [sg | th]

            # ---- N=2 output projection as VPU multiply + lane reduce (no MXU round trip) ----
            delta = jax.nn.sigmoid(
                jnp.sum(gt[:, :H2] * wso_b, axis=-1, keepdims=True) + bso_b)     # (B, 1)
            thr = jax.nn.sigmoid(
                jnp.sum(gt[:, H2:] * wto_b, axis=-1, keepdims=True) + bto_b)     # (B, 1)

            # ---- straight-through round (forward) + select-based gated update ----
            prob = cum + jnp.minimum(delta, 1.0 - cum)
            upd = prob > thr                                          # (B, 1) bool, exact 0/1 gate
            if need_valid_mask:
                valid = (chunk * T_CHUNK + t) < S                     # padded steps leave state untouched
                upd = jnp.logical_and(upd, valid)
                prob = jnp.where(valid, prob, cum)
            upd_b = jnp.broadcast_to(upd, (B, H))
            new_h = jnp.where(upd_b, h1, h0)
            new_c = jnp.where(upd_b, c1, c0)
            new_cum = jnp.where(upd, 0.0, prob)

            out_ref[t] = new_h
            return new_h, new_c, new_cum

        carry = (h_sc[...], c_sc[...], cum_sc[...])
        carry = lax.fori_loop(0, T_CHUNK, step, carry, unroll=unroll)
        h, c, cum = carry
        h_sc[...] = h
        c_sc[...] = c
        cum_sc[...] = cum

        # final cell state only needs to be written once (h_n is out[S-1])
        @pl.when(chunk == pl.num_programs(1) - 1)
        def _():
            cfin_ref[0] = c

    return kernel


def skip_torchlstm_forward(x, params, *, t_chunk=None, vmem_budget_bytes=8 * 1024 * 1024):
    """x: (S, B, I) float32. Returns (output (S,B,H), (h_n (1,B,H), c_n (1,B,H)))."""
    S, B, I = x.shape
    H4 = params["w_ih"].shape[0]
    H = H4 // 4
    H2 = params["wp"].shape[0]

    # ---- hoist the non-recurrent input projection out of the kernel (one big matmul) ----
    b_lstm = params["b_ih"] + params["b_hh"]
    xg = (x.reshape(S * B, I) @ params["w_ih"].T + b_lstm).astype(jnp.float32)
    xg = xg.reshape(S, B, 4 * H)

    # recurrent weight, pre-transposed so the kernel does h @ W (no in-kernel transpose)
    w_hh_t = params["w_hh"].T.astype(jnp.float32)                        # (H, 4H)

    # fused skip/threshold inner weight:  [c0 | c1] @ [[wp^T, wt^T], [wc^T, 0]]
    w_skip = jnp.concatenate(
        [jnp.concatenate([params["wp"].T, params["wt"].T], axis=1),
         jnp.concatenate([params["wc"].T, jnp.zeros((H, H2), jnp.float32)], axis=1)],
        axis=0).astype(jnp.float32)                                      # (2H, 2*H2)
    bg = jnp.concatenate([params["bp"] + params["bc"], params["bt"]]).reshape(1, 2 * H2)
    wso = params["wso"].reshape(1, H2).astype(jnp.float32)
    wto = params["wto"].reshape(1, H2).astype(jnp.float32)
    bgo = jnp.concatenate([params["bso"], params["bto"]]).reshape(1, 2)

    # ---- grid sizing ----
    B_TILE = _pick_b_tile(B)
    n_b = B // B_TILE

    if t_chunk is None:
        # double-buffered xg block + double-buffered out block per grid step
        per_step = 2 * (B_TILE * 4 * H * 4) + 2 * (B_TILE * H * 4)
        t_chunk = max(1, min(128, S, vmem_budget_bytes // max(per_step, 1)))
    T_CHUNK = int(t_chunk)
    n_chunks = pl.cdiv(S, T_CHUNK)
    S_pad = n_chunks * T_CHUNK
    if S_pad != S:
        xg = jnp.concatenate([xg, jnp.zeros((S_pad - S, B, 4 * H), xg.dtype)], axis=0)

    unroll = int(max(1, min(8, T_CHUNK)))          # partial unroll: LLO can overlap steps
    slice_gates = (H % 128 == 0)                   # lane-aligned -> halve EUP transcendental lanes
    kernel = _make_kernel(S, T_CHUNK, H, H2, unroll, S_pad != S, slice_gates)

    def full(arr):
        nd = arr.ndim
        return pl.BlockSpec(arr.shape, lambda b, g, _nd=nd: (0,) * _nd)

    grid_spec = pltpu.PrefetchScalarGridSpec(
        num_scalar_prefetch=0,
        grid=(n_b, n_chunks),
        in_specs=[
            pl.BlockSpec((T_CHUNK, B_TILE, 4 * H), lambda b, g: (g, b, 0)),   # precomputed x gates
            full(w_hh_t), full(w_skip), full(bg), full(wso), full(wto), full(bgo),
        ],
        out_specs=(
            pl.BlockSpec((T_CHUNK, B_TILE, H), lambda b, g: (g, b, 0)),       # outputs per chunk
            pl.BlockSpec((1, B_TILE, H), lambda b, g: (0, b, 0)),             # final c (last chunk only)
        ),
        scratch_shapes=[
            pltpu.VMEM((B_TILE, H), jnp.float32),   # h state
            pltpu.VMEM((B_TILE, H), jnp.float32),   # c state
            pltpu.VMEM((B_TILE, 1), jnp.float32),   # cumulative update prob
        ],
    )

    out_pad, c_fin = pl.pallas_call(
        kernel,
        out_shape=(
            jax.ShapeDtypeStruct((S_pad, B, H), jnp.float32),
            jax.ShapeDtypeStruct((1, B, H), jnp.float32),
        ),
        grid_spec=grid_spec,
        compiler_params=pltpu.CompilerParams(
            dimension_semantics=("parallel", "arbitrary"),   # batch parallel, time sequential
            vmem_limit_bytes=32 * 1024 * 1024),
    )(xg, w_hh_t, w_skip, bg, wso, wto, bgo)

    out = out_pad[:S]
    h_fin = out_pad[S - 1:S]                       # (1, B, H): final hidden state
    return out, (h_fin, c_fin)


def reference_forward(x, params):
    """Pure-JAX reference mirroring the PyTorch module (eval-mode numerics)."""
    S, B, I = x.shape
    H = params["w_hh"].shape[1]
    h = jnp.zeros((B, H), jnp.float32)
    c = jnp.zeros((B, H), jnp.float32)
    cum = jnp.ones((B, 1), jnp.float32)
    lrelu = lambda v: jnp.where(v >= 0, v, 0.01 * v)
    outs = []
    for t in range(S):
        xt = x[t]
        gates = (xt @ params["w_ih"].T + params["b_ih"]
                 + h @ params["w_hh"].T + params["b_hh"])
        i_g = jax.nn.sigmoid(gates[:, :H])
        f_g = jax.nn.sigmoid(gates[:, H:2 * H])
        g_g = jnp.tanh(gates[:, 2 * H:3 * H])
        o_g = jax.nn.sigmoid(gates[:, 3 * H:])
        c1 = f_g * c + i_g * g_g
        h1 = o_g * jnp.tanh(c1)
        sg = lrelu(c @ params["wp"].T + params["bp"] + c1 @ params["wc"].T + params["bc"])
        delta = jax.nn.sigmoid(sg @ params["wso"].T + params["bso"])
        th = lrelu(c @ params["wt"].T + params["bt"])
        thr = jax.nn.sigmoid(th @ params["wto"].T + params["bto"])
        prob = cum + jnp.minimum(delta, 1.0 - cum)
        gate = (prob > thr).astype(jnp.float32)
        h = gate * h1 + (1.0 - gate) * h
        c = gate * c1 + (1.0 - gate) * c
        cum = (1.0 - gate) * prob
        outs.append(h)
    return jnp.stack(outs, 0), h[None], c[None]


if __name__ == "__main__":
    S, B, I, H = 8, 2, 32, 32     # seq=8, batch=2, input_size=32, hidden=32
    H2 = H // 2

    key = jax.random.PRNGKey(0)
    ks = jax.random.split(key, 16)

    def u(k, shape, bound):
        return jax.random.uniform(k, shape, jnp.float32, -bound, bound)

    bh = 1.0 / float(jnp.sqrt(H))
    bh2 = 1.0 / float(jnp.sqrt(H2))
    params = dict(
        # nn.LSTM(input_size=I, hidden_size=H, num_layers=1)
        w_ih=u(ks[0], (4 * H, I), bh), w_hh=u(ks[1], (4 * H, H), bh),
        b_ih=u(ks[2], (4 * H,), bh), b_hh=u(ks[3], (4 * H,), bh),
        # skip_gate_inner_linear_prev / _curr : Linear(H, H//2)
        wp=u(ks[4], (H2, H), bh), bp=u(ks[5], (H2,), bh),
        wc=u(ks[6], (H2, H), bh), bc=u(ks[7], (H2,), bh),
        # skip_gate_out_linear : Linear(H//2, 1)
        wso=u(ks[8], (1, H2), bh2), bso=u(ks[9], (1,), bh2),
        # threshold_gate_inner_linear : Linear(H, H//2)
        wt=u(ks[10], (H2, H), bh), bt=u(ks[11], (H2,), bh),
        # threshold_gate_out_linear : Linear(H//2, 1)
        wto=u(ks[12], (1, H2), bh2), bto=u(ks[13], (1,), bh2),
    )
    x = jax.random.normal(ks[14], (S, B, I), jnp.float32)

    out, (h_n, c_n) = skip_torchlstm_forward(x, params)
    out = jax.block_until_ready(out)
    h_n = jax.block_until_ready(h_n)
    c_n = jax.block_until_ready(c_n)

    ref_out, ref_h, ref_c = reference_forward(x, params)
    assert jnp.allclose(out, ref_out, atol=1e-4, rtol=1e-4), "output mismatch"
    assert jnp.allclose(h_n, ref_h, atol=1e-4, rtol=1e-4), "h_n mismatch"
    assert jnp.allclose(c_n, ref_c, atol=1e-4, rtol=1e-4), "c_n mismatch"

    print("KERNEL_OK")
</pallas_src>

<mosaic_0001>
module attributes {stable_mosaic.version = 11 : i64} {
  func.func @kernel(%arg0: i32, %arg1: i32, %arg2: memref<8x2x128xf32, #tpu.memory_space<vmem>>, %arg3: memref<32x128xf32, #tpu.memory_space<vmem>>, %arg4: memref<64x32xf32, #tpu.memory_space<vmem>>, %arg5: memref<1x32xf32, #tpu.memory_space<vmem>>, %arg6: memref<1x16xf32, #tpu.memory_space<vmem>>, %arg7: memref<1x16xf32, #tpu.memory_space<vmem>>, %arg8: memref<1x2xf32, #tpu.memory_space<vmem>>, %arg9: memref<8x2x32xf32, #tpu.memory_space<vmem>>, %arg10: memref<1x2x32xf32, #tpu.memory_space<vmem>>, %arg11: memref<2x32xf32, #tpu.memory_space<vmem>>, %arg12: memref<2x32xf32, #tpu.memory_space<vmem>>, %arg13: memref<2x1xf32, #tpu.memory_space<vmem>>) attributes {dimension_semantics = [#tpu.dimension_semantics<parallel>, #tpu.dimension_semantics<arbitrary>], iteration_bounds = array<i64: 1, 1>, scalar_prefetch = 0 : i64, scratch_operands = 3 : i64, tpu.core_type = #tpu.core_type<tc>, window_params = [{transform_indices = @transform_0, window_bounds = array<i64: 8, 2, 128>}, {pipeline_mode = #tpu.pipeline_mode<synchronous>, transform_indices = @transform_1, window_bounds = array<i64: 32, 128>}, {pipeline_mode = #tpu.pipeline_mode<synchronous>, transform_indices = @transform_2, window_bounds = array<i64: 64, 32>}, {pipeline_mode = #tpu.pipeline_mode<synchronous>, transform_indices = @transform_3, window_bounds = array<i64: 1, 32>}, {pipeline_mode = #tpu.pipeline_mode<synchronous>, transform_indices = @transform_4, window_bounds = array<i64: 1, 16>}, {pipeline_mode = #tpu.pipeline_mode<synchronous>, transform_indices = @transform_5, window_bounds = array<i64: 1, 16>}, {pipeline_mode = #tpu.pipeline_mode<synchronous>, transform_indices = @transform_6, window_bounds = array<i64: 1, 2>}, {transform_indices = @transform_7, window_bounds = array<i64: 8, 2, 32>}, {transform_indices = @transform_8, window_bounds = array<i64: 1, 2, 32>}]} {
    %c0_i32 = arith.constant 0 : i32
    %0 = arith.cmpi eq, %arg1, %c0_i32 : i32
    %1 = arith.extui %0 : i1 to i32
    %c0_i32_0 = arith.constant 0 : i32
    %2 = arith.cmpi ne, %1, %c0_i32_0 : i32
    scf.if %2 {
      %cst_146 = arith.constant 0.000000e+00 : f32
      %532 = vector.broadcast %cst_146 : f32 to vector<2x32xf32>
      %c0_147 = arith.constant 0 : index
      %c0_148 = arith.constant 0 : index
      %533 = vector.load %arg11[%c0_147, %c0_148] : memref<2x32xf32, #tpu.memory_space<vmem>>, vector<2x32xf32>
      tpu.vector_store %arg11[%c0_147, %c0_148], %532 {strides = array<i32>} : memref<2x32xf32, #tpu.memory_space<vmem>>, vector<2x32xf32>,
      %cst_149 = arith.constant 0.000000e+00 : f32
      %534 = vector.broadcast %cst_149 : f32 to vector<2x32xf32>
      %c0_150 = arith.constant 0 : index
      %c0_151 = arith.constant 0 : index
      %535 = vector.load %arg12[%c0_150, %c0_151] : memref<2x32xf32, #tpu.memory_space<vmem>>, vector<2x32xf32>
      tpu.vector_store %arg12[%c0_150, %c0_151], %534 {strides = array<i32>} : memref<2x32xf32, #tpu.memory_space<vmem>>, vector<2x32xf32>,
      %cst_152 = arith.constant 1.000000e+00 : f32
      %536 = vector.broadcast %cst_152 : f32 to vector<2x1xf32>
      %c0_153 = arith.constant 0 : index
      %c0_154 = arith.constant 0 : index
      %537 = vector.load %arg13[%c0_153, %c0_154] : memref<2x1xf32, #tpu.memory_space<vmem>>, vector<2x1xf32>
      tpu.vector_store %arg13[%c0_153, %c0_154], %536 {strides = array<i32>} : memref<2x1xf32, #tpu.memory_space<vmem>>, vector<2x1xf32>,
    } else {
    }
    %c0 = arith.constant 0 : index
    %c0_1 = arith.constant 0 : index
    %3 = vector.load %arg3[%c0, %c0_1] : memref<32x128xf32, #tpu.memory_space<vmem>>, vector<32x128xf32>
    %c0_2 = arith.constant 0 : index
    %c0_3 = arith.constant 0 : index
    %4 = vector.load %arg4[%c0_2, %c0_3] : memref<64x32xf32, #tpu.memory_space<vmem>>, vector<64x32xf32>
    %c0_4 = arith.constant 0 : index
    %c0_5 = arith.constant 0 : index
    %5 = vector.load %arg5[%c0_4, %c0_5] : memref<1x32xf32, #tpu.memory_space<vmem>>, vector<1x32xf32>
    %6 = vector.shape_cast %5 : vector<1x32xf32> to vector<1x32xf32>
    %7 = vector.broadcast %6 : vector<1x32xf32> to vector<2x32xf32>
    %c0_6 = arith.constant 0 : index
    %c0_7 = arith.constant 0 : index
    %8 = vector.load %arg6[%c0_6, %c0_7] : memref<1x16xf32, #tpu.memory_space<vmem>>, vector<1x16xf32>
    %9 = vector.shape_cast %8 : vector<1x16xf32> to vector<1x16xf32>
    %10 = vector.broadcast %9 : vector<1x16xf32> to vector<2x16xf32>
    %c0_8 = arith.constant 0 : index
    %c0_9 = arith.constant 0 : index
    %11 = vector.load %arg7[%c0_8, %c0_9] : memref<1x16xf32, #tpu.memory_space<vmem>>, vector<1x16xf32>
    %12 = vector.shape_cast %11 : vector<1x16xf32> to vector<1x16xf32>
    %13 = vector.broadcast %12 : vector<1x16xf32> to vector<2x16xf32>
    %c0_10 = arith.constant 0 : index
    %c0_11 = arith.constant 0 : index
    %14 = vector.load %arg8[%c0_10, %c0_11] : memref<1x2xf32, #tpu.memory_space<vmem>>, vector<1x2xf32>
    %15 = vector.shape_cast %14 : vector<1x2xf32> to vector<1x2xf32>
    %16 = vector.broadcast %15 : vector<1x2xf32> to vector<2x2xf32>
    %17 = vector.extract_strided_slice %16 {offsets = [0, 0], sizes = [2, 1], strides = [1, 1]} : vector<2x2xf32> to vector<2x1xf32>
    %18 = vector.extract_strided_slice %16 {offsets = [0, 1], sizes = [2, 1], strides = [1, 1]} : vector<2x2xf32> to vector<2x1xf32>
    %c0_12 = arith.constant 0 : index
    %c0_13 = arith.constant 0 : index
    %19 = vector.load %arg11[%c0_12, %c0_13] : memref<2x32xf32, #tpu.memory_space<vmem>>, vector<2x32xf32>
    %c0_14 = arith.constant 0 : index
    %c0_15 = arith.constant 0 : index
    %20 = vector.load %arg12[%c0_14, %c0_15] : memref<2x32xf32, #tpu.memory_space<vmem>>, vector<2x32xf32>
    %c0_16 = arith.constant 0 : index
    %c0_17 = arith.constant 0 : index
    %21 = vector.load %arg13[%c0_16, %c0_17] : memref<2x1xf32, #tpu.memory_space<vmem>>, vector<2x1xf32>
    %c0_i32_18 = arith.constant 0 : i32
    %22 = arith.index_cast %c0_i32_18 : i32 to index
    %c0_19 = arith.constant 0 : index
    %c0_20 = arith.constant 0 : index
    %23 = vector.load %arg2[%22, %c0_19, %c0_20] : memref<8x2x128xf32, #tpu.memory_space<vmem>>, vector<1x2x128xf32>
    %24 = vector.shape_cast %23 : vector<1x2x128xf32> to vector<2x128xf32>
    %cst = arith.constant dense<0.000000e+00> : vector<2x128xf32>
    %25 = tpu.matmul %19, %3, %cst {dimension_numbers = #tpu.dot_dimension_numbers<[1], [0], [0], [1], [0, 0, 1, 1], [], []>} : vector<2x32xf32>, vector<32x128xf32>, vector<2x128xf32> -> vector<2x128xf32>
    %26 = arith.addf %24, %25 : vector<2x128xf32>
    %27 = arith.negf %26 : vector<2x128xf32>
    %28 = math.exp %27 : vector<2x128xf32>
    %cst_21 = arith.constant 1.000000e+00 : f32
    %29 = vector.broadcast %cst_21 : f32 to vector<2x128xf32>
    %30 = arith.addf %29, %28 : vector<2x128xf32>
    %31 = arith.divf %29, %30 : vector<2x128xf32>
    %32 = math.tanh %26 : vector<2x128xf32>
    %33 = vector.extract_strided_slice %31 {offsets = [0, 0], sizes = [2, 32], strides = [1, 1]} : vector<2x128xf32> to vector<2x32xf32>
    %34 = vector.extract_strided_slice %31 {offsets = [0, 32], sizes = [2, 32], strides = [1, 1]} : vector<2x128xf32> to vector<2x32xf32>
    %35 = vector.extract_strided_slice %32 {offsets = [0, 64], sizes = [2, 32], strides = [1, 1]} : vector<2x128xf32> to vector<2x32xf32>
    %36 = vector.extract_strided_slice %31 {offsets = [0, 96], sizes = [2, 32], strides = [1, 1]} : vector<2x128xf32> to vector<2x32xf32>
    %37 = arith.mulf %34, %20 : vector<2x32xf32>
    %38 = arith.mulf %33, %35 : vector<2x32xf32>
    %39 = arith.addf %37, %38 : vector<2x32xf32>
    %40 = math.tanh %39 : vector<2x32xf32>
    %41 = arith.mulf %36, %40 : vector<2x32xf32>
    %42 = tpu.concatenate %20, %39 in 1 : vector<2x32xf32>, vector<2x32xf32> -> vector<2x64xf32>
    %cst_22 = arith.constant dense<0.000000e+00> : vector<2x32xf32>
    %43 = tpu.matmul %42, %4, %cst_22 {dimension_numbers = #tpu.dot_dimension_numbers<[1], [0], [0], [1], [0, 0, 1, 1], [], []>} : vector<2x64xf32>, vector<64x32xf32>, vector<2x32xf32> -> vector<2x32xf32>
    %44 = arith.addf %43, %7 : vector<2x32xf32>
    %cst_23 = arith.constant 0.000000e+00 : f32
    %45 = vector.broadcast %cst_23 : f32 to vector<2x32xf32>
    %46 = arith.cmpf oge, %44, %45 : vector<2x32xf32>
    %cst_24 = arith.constant 0.00999999977 : f32
    %47 = vector.broadcast %cst_24 : f32 to vector<2x32xf32>
    %48 = arith.mulf %47, %44 : vector<2x32xf32>
    %49 = arith.select %46, %44, %48 : vector<2x32xi1>, vector<2x32xf32>
    %50 = vector.extract_strided_slice %49 {offsets = [0, 0], sizes = [2, 16], strides = [1, 1]} : vector<2x32xf32> to vector<2x16xf32>
    %51 = arith.mulf %50, %10 : vector<2x16xf32>
    %cst_25 = arith.constant dense<0.000000e+00> : vector<2xf32>
    %52 = vector.multi_reduction <add>, %51, %cst_25 [1] : vector<2x16xf32> to vector<2xf32>
    %53 = vector.shape_cast %52 : vector<2xf32> to vector<2x1xf32>
    %54 = arith.addf %53, %17 : vector<2x1xf32>
    %55 = arith.negf %54 : vector<2x1xf32>
    %56 = math.exp %55 : vector<2x1xf32>
    %cst_26 = arith.constant 1.000000e+00 : f32
    %57 = vector.broadcast %cst_26 : f32 to vector<2x1xf32>
    %58 = arith.addf %57, %56 : vector<2x1xf32>
    %59 = arith.divf %57, %58 : vector<2x1xf32>
    %60 = vector.extract_strided_slice %49 {offsets = [0, 16], sizes = [2, 16], strides = [1, 1]} : vector<2x32xf32> to vector<2x16xf32>
    %61 = arith.mulf %60, %13 : vector<2x16xf32>
    %cst_27 = arith.constant dense<0.000000e+00> : vector<2xf32>
    %62 = vector.multi_reduction <add>, %61, %cst_27 [1] : vector<2x16xf32> to vector<2xf32>
    %63 = vector.shape_cast %62 : vector<2xf32> to vector<2x1xf32>
    %64 = arith.addf %63, %18 : vector<2x1xf32>
    %65 = arith.negf %64 : vector<2x1xf32>
    %66 = math.exp %65 : vector<2x1xf32>
    %cst_28 = arith.constant 1.000000e+00 : f32
    %67 = vector.broadcast %cst_28 : f32 to vector<2x1xf32>
    %68 = arith.addf %67, %66 : vector<2x1xf32>
    %69 = arith.divf %67, %68 : vector<2x1xf32>
    %cst_29 = arith.constant 1.000000e+00 : f32
    %70 = vector.broadcast %cst_29 : f32 to vector<2x1xf32>
    %71 = arith.subf %70, %21 : vector<2x1xf32>
    %72 = arith.minimumf %59, %71 : vector<2x1xf32>
    %73 = arith.addf %21, %72 : vector<2x1xf32>
    %74 = arith.cmpf ogt, %73, %69 : vector<2x1xf32>
    %75 = vector.shape_cast %74 : vector<2x1xi1> to vector<2x1xi1>
    %76 = vector.broadcast %75 : vector<2x1xi1> to vector<2x32xi1>
    %77 = arith.select %76, %41, %19 : vector<2x32xi1>, vector<2x32xf32>
    %78 = arith.select %76, %39, %20 : vector<2x32xi1>, vector<2x32xf32>
    %cst_30 = arith.constant 0.000000e+00 : f32
    %79 = vector.broadcast %cst_30 : f32 to vector<2x1xf32>
    %80 = arith.select %74, %79, %73 : vector<2x1xi1>, vector<2x1xf32>
    %81 = arith.index_cast %c0_i32_18 : i32 to index
    %c0_31 = arith.constant 0 : index
    %c0_32 = arith.constant 0 : index
    %82 = vector.load %arg9[%81, %c0_31, %c0_32] : memref<8x2x32xf32, #tpu.memory_space<vmem>>, vector<1x2x32xf32>
    %83 = vector.shape_cast %82 : vector<1x2x32xf32> to vector<2x32xf32>
    %84 = vector.shape_cast %77 : vector<2x32xf32> to vector<1x2x32xf32>
    tpu.vector_store %arg9[%81, %c0_31, %c0_32], %84 {strides = array<i32>} : memref<8x2x32xf32, #tpu.memory_space<vmem>>, vector<1x2x32xf32>,
    %c1_i32 = arith.constant 1 : i32
    %85 = arith.index_cast %c1_i32 : i32 to index
    %c0_33 = arith.constant 0 : index
    %c0_34 = arith.constant 0 : index
    %86 = vector.load %arg2[%85, %c0_33, %c0_34] : memref<8x2x128xf32, #tpu.memory_space<vmem>>, vector<1x2x128xf32>
    %87 = vector.shape_cast %86 : vector<1x2x128xf32> to vector<2x128xf32>
    %cst_35 = arith.constant dense<0.000000e+00> : vector<2x128xf32>
    %88 = tpu.matmul %77, %3, %cst_35 {dimension_numbers = #tpu.dot_dimension_numbers<[1], [0], [0], [1], [0, 0, 1, 1], [], []>} : vector<2x32xf32>, vector<32x128xf32>, vector<2x128xf32> -> vector<2x128xf32>
    %89 = arith.addf %87, %88 : vector<2x128xf32>
    %90 = arith.negf %89 : vector<2x128xf32>
    %91 = math.exp %90 : vector<2x128xf32>
    %cst_36 = arith.constant 1.000000e+00 : f32
    %92 = vector.broadcast %cst_36 : f32 to vector<2x128xf32>
    %93 = arith.addf %92, %91 : vector<2x128xf32>
    %94 = arith.divf %92, %93 : vector<2x128xf32>
    %95 = math.tanh %89 : vector<2x128xf32>
    %96 = vector.extract_strided_slice %94 {offsets = [0, 0], sizes = [2, 32], strides = [1, 1]} : vector<2x128xf32> to vector<2x32xf32>
    %97 = vector.extract_strided_slice %94 {offsets = [0, 32], sizes = [2, 32], strides = [1, 1]} : vector<2x128xf32> to vector<2x32xf32>
    %98 = vector.extract_strided_slice %95 {offsets = [0, 64], sizes = [2, 32], strides = [1, 1]} : vector<2x128xf32> to vector<2x32xf32>
    %99 = vector.extract_strided_slice %94 {offsets = [0, 96], sizes = [2, 32], strides = [1, 1]} : vector<2x128xf32> to vector<2x32xf32>
    %100 = arith.mulf %97, %78 : vector<2x32xf32>
    %101 = arith.mulf %96, %98 : vector<2x32xf32>
    %102 = arith.addf %100, %101 : vector<2x32xf32>
    %103 = math.tanh %102 : vector<2x32xf32>
    %104 = arith.mulf %99, %103 : vector<2x32xf32>
    %105 = tpu.concatenate %78, %102 in 1 : vector<2x32xf32>, vector<2x32xf32> -> vector<2x64xf32>
    %cst_37 = arith.constant dense<0.000000e+00> : vector<2x32xf32>
    %106 = tpu.matmul %105, %4, %cst_37 {dimension_numbers = #tpu.dot_dimension_numbers<[1], [0], [0], [1], [0, 0, 1, 1], [], []>} : vector<2x64xf32>, vector<64x32xf32>, vector<2x32xf32> -> vector<2x32xf32>
    %107 = arith.addf %106, %7 : vector<2x32xf32>
    %cst_38 = arith.constant 0.000000e+00 : f32
    %108 = vector.broadcast %cst_38 : f32 to vector<2x32xf32>
    %109 = arith.cmpf oge, %107, %108 : vector<2x32xf32>
    %cst_39 = arith.constant 0.00999999977 : f32
    %110 = vector.broadcast %cst_39 : f32 to vector<2x32xf32>
    %111 = arith.mulf %110, %107 : vector<2x32xf32>
    %112 = arith.select %109, %107, %111 : vector<2x32xi1>, vector<2x32xf32>
    %113 = vector.extract_strided_slice %112 {offsets = [0, 0], sizes = [2, 16], strides = [1, 1]} : vector<2x32xf32> to vector<2x16xf32>
    %114 = arith.mulf %113, %10 : vector<2x16xf32>
    %cst_40 = arith.constant dense<0.000000e+00> : vector<2xf32>
    %115 = vector.multi_reduction <add>, %114, %cst_40 [1] : vector<2x16xf32> to vector<2xf32>
    %116 = vector.shape_cast %115 : vector<2xf32> to vector<2x1xf32>
    %117 = arith.addf %116, %17 : vector<2x1xf32>
    %118 = arith.negf %117 : vector<2x1xf32>
    %119 = math.exp %118 : vector<2x1xf32>
    %cst_41 = arith.constant 1.000000e+00 : f32
    %120 = vector.broadcast %cst_41 : f32 to vector<2x1xf32>
    %121 = arith.addf %120, %119 : vector<2x1xf32>
    %122 = arith.divf %120, %121 : vector<2x1xf32>
    %123 = vector.extract_strided_slice %112 {offsets = [0, 16], sizes = [2, 16], strides = [1, 1]} : vector<2x32xf32> to vector<2x16xf32>
    %124 = arith.mulf %123, %13 : vector<2x16xf32>
    %cst_42 = arith.constant dense<0.000000e+00> : vector<2xf32>
    %125 = vector.multi_reduction <add>, %124, %cst_42 [1] : vector<2x16xf32> to vector<2xf32>
    %126 = vector.shape_cast %125 : vector<2xf32> to vector<2x1xf32>
    %127 = arith.addf %126, %18 : vector<2x1xf32>
    %128 = arith.negf %127 : vector<2x1xf32>
    %129 = math.exp %128 : vector<2x1xf32>
    %cst_43 = arith.constant 1.000000e+00 : f32
    %130 = vector.broadcast %cst_43 : f32 to vector<2x1xf32>
    %131 = arith.addf %130, %129 : vector<2x1xf32>
    %132 = arith.divf %130, %131 : vector<2x1xf32>
    %cst_44 = arith.constant 1.000000e+00 : f32
    %133 = vector.broadcast %cst_44 : f32 to vector<2x1xf32>
    %134 = arith.subf %133, %80 : vector<2x1xf32>
    %135 = arith.minimumf %122, %134 : vector<2x1xf32>
    %136 = arith.addf %80, %135 : vector<2x1xf32>
    %137 = arith.cmpf ogt, %136, %132 : vector<2x1xf32>
    %138 = vector.shape_cast %137 : vector<2x1xi1> to vector<2x1xi1>
    %139 = vector.broadcast %138 : vector<2x1xi1> to vector<2x32xi1>
    %140 = arith.select %139, %104, %77 : vector<2x32xi1>, vector<2x32xf32>
    %141 = arith.select %139, %102, %78 : vector<2x32xi1>, vector<2x32xf32>
    %cst_45 = arith.constant 0.000000e+00 : f32
    %142 = vector.broadcast %cst_45 : f32 to vector<2x1xf32>
    %143 = arith.select %137, %142, %136 : vector<2x1xi1>, vector<2x1xf32>
    %144 = arith.index_cast %c1_i32 : i32 to index
    %c0_46 = arith.constant 0 : index
    %c0_47 = arith.constant 0 : index
    %145 = vector.load %arg9[%144, %c0_46, %c0_47] : memref<8x2x32xf32, #tpu.memory_space<vmem>>, vector<1x2x32xf32>
    %146 = vector.shape_cast %145 : vector<1x2x32xf32> to vector<2x32xf32>
    %147 = vector.shape_cast %140 : vector<2x32xf32> to vector<1x2x32xf32>
    tpu.vector_store %arg9[%144, %c0_46, %c0_47], %147 {strides = array<i32>} : memref<8x2x32xf32, #tpu.memory_space<vmem>>, vector<1x2x32xf32>,
    %c2_i32 = arith.constant 2 : i32
    %148 = arith.index_cast %c2_i32 : i32 to index
    %c0_48 = arith.constant 0 : index
    %c0_49 = arith.constant 0 : index
    %149 = vector.load %arg2[%148, %c0_48, %c0_49] : memref<8x2x128xf32, #tpu.memory_space<vmem>>, vector<1x2x128xf32>
    %150 = vector.shape_cast %149 : vector<1x2x128xf32> to vector<2x128xf32>
    %cst_50 = arith.constant dense<0.000000e+00> : vector<2x128xf32>
    %151 = tpu.matmul %140, %3, %cst_50 {dimension_numbers = #tpu.dot_dimension_numbers<[1], [0], [0], [1], [0, 0, 1, 1], [], []>} : vector<2x32xf32>, vector<32x128xf32>, vector<2x128xf32> -> vector<2x128xf32>
    %152 = arith.addf %150, %151 : vector<2x128xf32>
    %153 = arith.negf %152 : vector<2x128xf32>
    %154 = math.exp %153 : vector<2x128xf32>
    %cst_51 = arith.constant 1.000000e+00 : f32
    %155 = vector.broadcast %cst_51 : f32 to vector<2x128xf32>
    %156 = arith.addf %155, %154 : vector<2x128xf32>
    %157 = arith.divf %155, %156 : vector<2x128xf32>
    %158 = math.tanh %152 : vector<2x128xf32>
    %159 = vector.extract_strided_slice %157 {offsets = [0, 0], sizes = [2, 32], strides = [1, 1]} : vector<2x128xf32> to vector<2x32xf32>
    %160 = vector.extract_strided_slice %157 {offsets = [0, 32], sizes = [2, 32], strides = [1, 1]} : vector<2x128xf32> to vector<2x32xf32>
    %161 = vector.extract_strided_slice %158 {offsets = [0, 64], sizes = [2, 32], strides = [1, 1]} : vector<2x128xf32> to vector<2x32xf32>
    %162 = vector.extract_strided_slice %157 {offsets = [0, 96], sizes = [2, 32], strides = [1, 1]} : vector<2x128xf32> to vector<2x32xf32>
    %163 = arith.mulf %160, %141 : vector<2x32xf32>
    %164 = arith.mulf %159, %161 : vector<2x32xf32>
    %165 = arith.addf %163, %164 : vector<2x32xf32>
    %166 = math.tanh %165 : vector<2x32xf32>
    %167 = arith.mulf %162, %166 : vector<2x32xf32>
    %168 = tpu.concatenate %141, %165 in 1 : vector<2x32xf32>, vector<2x32xf32> -> vector<2x64xf32>
    %cst_52 = arith.constant dense<0.000000e+00> : vector<2x32xf32>
    %169 = tpu.matmul %168, %4, %cst_52 {dimension_numbers = #tpu.dot_dimension_numbers<[1], [0], [0], [1], [0, 0, 1, 1], [], []>} : vector<2x64xf32>, vector<64x32xf32>, vector<2x32xf32> -> vector<2x32xf32>
    %170 = arith.addf %169, %7 : vector<2x32xf32>
    %cst_53 = arith.constant 0.000000e+00 : f32
    %171 = vector.broadcast %cst_53 : f32 to vector<2x32xf32>
    %172 = arith.cmpf oge, %170, %171 : vector<2x32xf32>
    %cst_54 = arith.constant 0.00999999977 : f32
    %173 = vector.broadcast %cst_54 : f32 to vector<2x32xf32>
    %174 = arith.mulf %173, %170 : vector<2x32xf32>
    %175 = arith.select %172, %170, %174 : vector<2x32xi1>, vector<2x32xf32>
    %176 = vector.extract_strided_slice %175 {offsets = [0, 0], sizes = [2, 16], strides = [1, 1]} : vector<2x32xf32> to vector<2x16xf32>
    %177 = arith.mulf %176, %10 : vector<2x16xf32>
    %cst_55 = arith.constant dense<0.000000e+00> : vector<2xf32>
    %178 = vector.multi_reduction <add>, %177, %cst_55 [1] : vector<2x16xf32> to vector<2xf32>
    %179 = vector.shape_cast %178 : vector<2xf32> to vector<2x1xf32>
    %180 = arith.addf %179, %17 : vector<2x1xf32>
    %181 = arith.negf %180 : vector<2x1xf32>
    %182 = math.exp %181 : vector<2x1xf32>
    %cst_56 = arith.constant 1.000000e+00 : f32
    %183 = vector.broadcast %cst_56 : f32 to vector<2x1xf32>
    %184 = arith.addf %183, %182 : vector<2x1xf32>
    %185 = arith.divf %183, %184 : vector<2x1xf32>
    %186 = vector.extract_strided_slice %175 {offsets = [0, 16], sizes = [2, 16], strides = [1, 1]} : vector<2x32xf32> to vector<2x16xf32>
    %187 = arith.mulf %186, %13 : vector<2x16xf32>
    %cst_57 = arith.constant dense<0.000000e+00> : vector<2xf32>
    %188 = vector.multi_reduction <add>, %187, %cst_57 [1] : vector<2x16xf32> to vector<2xf32>
    %189 = vector.shape_cast %188 : vector<2xf32> to vector<2x1xf32>
    %190 = arith.addf %189, %18 : vector<2x1xf32>
    %191 = arith.negf %190 : vector<2x1xf32>
    %192 = math.exp %191 : vector<2x1xf32>
    %cst_58 = arith.constant 1.000000e+00 : f32
    %193 = vector.broadcast %cst_58 : f32 to vector<2x1xf32>
    %194 = arith.addf %193, %192 : vector<2x1xf32>
    %195 = arith.divf %193, %194 : vector<2x1xf32>
    %cst_59 = arith.constant 1.000000e+00 : f32
    %196 = vector.broadcast %cst_59 : f32 to vector<2x1xf32>
    %197 = arith.subf %196, %143 : vector<2x1xf32>
    %198 = arith.minimumf %185, %197 : vector<2x1xf32>
    %199 = arith.addf %143, %198 : vector<2x1xf32>
    %200 = arith.cmpf ogt, %199, %195 : vector<2x1xf32>
    %201 = vector.shape_cast %200 : vector<2x1xi1> to vector<2x1xi1>
    %202 = vector.broadcast %201 : vector<2x1xi1> to vector<2x32xi1>
    %203 = arith.select %202, %167, %140 : vector<2x32xi1>, vector<2x32xf32>
    %204 = arith.select %202, %165, %141 : vector<2x32xi1>, vector<2x32xf32>
    %cst_60 = arith.constant 0.000000e+00 : f32
    %205 = vector.broadcast %cst_60 : f32 to vector<2x1xf32>
    %206 = arith.select %200, %205, %199 : vector<2x1xi1>, vector<2x1xf32>
    %207 = arith.index_cast %c2_i32 : i32 to index
    %c0_61 = arith.constant 0 : index
    %c0_62 = arith.constant 0 : index
    %208 = vector.load %arg9[%207, %c0_61, %c0_62] : memref<8x2x32xf32, #tpu.memory_space<vmem>>, vector<1x2x32xf32>
    %209 = vector.shape_cast %208 : vector<1x2x32xf32> to vector<2x32xf32>
    %210 = vector.shape_cast %203 : vector<2x32xf32> to vector<1x2x32xf32>
    tpu.vector_store %arg9[%207, %c0_61, %c0_62], %210 {strides = array<i32>} : memref<8x2x32xf32, #tpu.memory_space<vmem>>, vector<1x2x32xf32>,
    %c3_i32 = arith.constant 3 : i32
    %211 = arith.index_cast %c3_i32 : i32 to index
    %c0_63 = arith.constant 0 : index
    %c0_64 = arith.constant 0 : index
    %212 = vector.load %arg2[%211, %c0_63, %c0_64] : memref<8x2x128xf32, #tpu.memory_space<vmem>>, vector<1x2x128xf32>
    %213 = vector.shape_cast %212 : vector<1x2x128xf32> to vector<2x128xf32>
    %cst_65 = arith.constant dense<0.000000e+00> : vector<2x128xf32>
    %214 = tpu.matmul %203, %3, %cst_65 {dimension_numbers = #tpu.dot_dimension_numbers<[1], [0], [0], [1], [0, 0, 1, 1], [], []>} : vector<2x32xf32>, vector<32x128xf32>, vector<2x128xf32> -> vector<2x128xf32>
    %215 = arith.addf %213, %214 : vector<2x128xf32>
    %216 = arith.negf %215 : vector<2x128xf32>
    %217 = math.exp %216 : vector<2x128xf32>
    %cst_66 = arith.constant 1.000000e+00 : f32
    %218 = vector.broadcast %cst_66 : f32 to vector<2x128xf32>
    %219 = arith.addf %218, %217 : vector<2x128xf32>
    %220 = arith.divf %218, %219 : vector<2x128xf32>
    %221 = math.tanh %215 : vector<2x128xf32>
    %222 = vector.extract_strided_slice %220 {offsets = [0, 0], sizes = [2, 32], strides = [1, 1]} : vector<2x128xf32> to vector<2x32xf32>
    %223 = vector.extract_strided_slice %220 {offsets = [0, 32], sizes = [2, 32], strides = [1, 1]} : vector<2x128xf32> to vector<2x32xf32>
    %224 = vector.extract_strided_slice %221 {offsets = [0, 64], sizes = [2, 32], strides = [1, 1]} : vector<2x128xf32> to vector<2x32xf32>
    %225 = vector.extract_strided_slice %220 {offsets = [0, 96], sizes = [2, 32], strides = [1, 1]} : vector<2x128xf32> to vector<2x32xf32>
    %226 = arith.mulf %223, %204 : vector<2x32xf32>
    %227 = arith.mulf %222, %224 : vector<2x32xf32>
    %228 = arith.addf %226, %227 : vector<2x32xf32>
    %229 = math.tanh %228 : vector<2x32xf32>
    %230 = arith.mulf %225, %229 : vector<2x32xf32>
    %231 = tpu.concatenate %204, %228 in 1 : vector<2x32xf32>, vector<2x32xf32> -> vector<2x64xf32>
    %cst_67 = arith.constant dense<0.000000e+00> : vector<2x32xf32>
    %232 = tpu.matmul %231, %4, %cst_67 {dimension_numbers = #tpu.dot_dimension_numbers<[1], [0], [0], [1], [0, 0, 1, 1], [], []>} : vector<2x64xf32>, vector<64x32xf32>, vector<2x32xf32> -> vector<2x32xf32>
    %233 = arith.addf %232, %7 : vector<2x32xf32>
    %cst_68 = arith.constant 0.000000e+00 : f32
    %234 = vector.broadcast %cst_68 : f32 to vector<2x32xf32>
    %235 = arith.cmpf oge, %233, %234 : vector<2x32xf32>
    %cst_69 = arith.constant 0.00999999977 : f32
    %236 = vector.broadcast %cst_69 : f32 to vector<2x32xf32>
    %237 = arith.mulf %236, %233 : vector<2x32xf32>
    %238 = arith.select %235, %233, %237 : vector<2x32xi1>, vector<2x32xf32>
    %239 = vector.extract_strided_slice %238 {offsets = [0, 0], sizes = [2, 16], strides = [1, 1]} : vector<2x32xf32> to vector<2x16xf32>
    %240 = arith.mulf %239, %10 : vector<2x16xf32>
    %cst_70 = arith.constant dense<0.000000e+00> : vector<2xf32>
    %241 = vector.multi_reduction <add>, %240, %cst_70 [1] : vector<2x16xf32> to vector<2xf32>
    %242 = vector.shape_cast %241 : vector<2xf32> to vector<2x1xf32>
    %243 = arith.addf %242, %17 : vector<2x1xf32>
    %244 = arith.negf %243 : vector<2x1xf32>
    %245 = math.exp %244 : vector<2x1xf32>
    %cst_71 = arith.constant 1.000000e+00 : f32
    %246 = vector.broadcast %cst_71 : f32 to vector<2x1xf32>
    %247 = arith.addf %246, %245 : vector<2x1xf32>
    %248 = arith.divf %246, %247 : vector<2x1xf32>
    %249 = vector.extract_strided_slice %238 {offsets = [0, 16], sizes = [2, 16], strides = [1, 1]} : vector<2x32xf32> to vector<2x16xf32>
    %250 = arith.mulf %249, %13 : vector<2x16xf32>
    %cst_72 = arith.constant dense<0.000000e+00> : vector<2xf32>
    %251 = vector.multi_reduction <add>, %250, %cst_72 [1] : vector<2x16xf32> to vector<2xf32>
    %252 = vector.shape_cast %251 : vector<2xf32> to vector<2x1xf32>
    %253 = arith.addf %252, %18 : vector<2x1xf32>
    %254 = arith.negf %253 : vector<2x1xf32>
    %255 = math.exp %254 : vector<2x1xf32>
    %cst_73 = arith.constant 1.000000e+00 : f32
    %256 = vector.broadcast %cst_73 : f32 to vector<2x1xf32>
    %257 = arith.addf %256, %255 : vector<2x1xf32>
    %258 = arith.divf %256, %257 : vector<2x1xf32>
    %cst_74 = arith.constant 1.000000e+00 : f32
    %259 = vector.broadcast %cst_74 : f32 to vector<2x1xf32>
    %260 = arith.subf %259, %206 : vector<2x1xf32>
    %261 = arith.minimumf %248, %260 : vector<2x1xf32>
    %262 = arith.addf %206, %261 : vector<2x1xf32>
    %263 = arith.cmpf ogt, %262, %258 : vector<2x1xf32>
    %264 = vector.shape_cast %263 : vector<2x1xi1> to vector<2x1xi1>
    %265 = vector.broadcast %264 : vector<2x1xi1> to vector<2x32xi1>
    %266 = arith.select %265, %230, %203 : vector<2x32xi1>, vector<2x32xf32>
    %267 = arith.select %265, %228, %204 : vector<2x32xi1>, vector<2x32xf32>
    %cst_75 = arith.constant 0.000000e+00 : f32
    %268 = vector.broadcast %cst_75 : f32 to vector<2x1xf32>
    %269 = arith.select %263, %268, %262 : vector<2x1xi1>, vector<2x1xf32>
    %270 = arith.index_cast %c3_i32 : i32 to index
    %c0_76 = arith.constant 0 : index
    %c0_77 = arith.constant 0 : index
    %271 = vector.load %arg9[%270, %c0_76, %c0_77] : memref<8x2x32xf32, #tpu.memory_space<vmem>>, vector<1x2x32xf32>
    %272 = vector.shape_cast %271 : vector<1x2x32xf32> to vector<2x32xf32>
    %273 = vector.shape_cast %266 : vector<2x32xf32> to vector<1x2x32xf32>
    tpu.vector_store %arg9[%270, %c0_76, %c0_77], %273 {strides = array<i32>} : memref<8x2x32xf32, #tpu.memory_space<vmem>>, vector<1x2x32xf32>,
    %c4_i32 = arith.constant 4 : i32
    %274 = arith.index_cast %c4_i32 : i32 to index
    %c0_78 = arith.constant 0 : index
    %c0_79 = arith.constant 0 : index
    %275 = vector.load %arg2[%274, %c0_78, %c0_79] : memref<8x2x128xf32, #tpu.memory_space<vmem>>, vector<1x2x128xf32>
    %276 = vector.shape_cast %275 : vector<1x2x128xf32> to vector<2x128xf32>
    %cst_80 = arith.constant dense<0.000000e+00> : vector<2x128xf32>
    %277 = tpu.matmul %266, %3, %cst_80 {dimension_numbers = #tpu.dot_dimension_numbers<[1], [0], [0], [1], [0, 0, 1, 1], [], []>} : vector<2x32xf32>, vector<32x128xf32>, vector<2x128xf32> -> vector<2x128xf32>
    %278 = arith.addf %276, %277 : vector<2x128xf32>
    %279 = arith.negf %278 : vector<2x128xf32>
    %280 = math.exp %279 : vector<2x128xf32>
    %cst_81 = arith.constant 1.000000e+00 : f32
    %281 = vector.broadcast %cst_81 : f32 to vector<2x128xf32>
    %282 = arith.addf %281, %280 : vector<2x128xf32>
    %283 = arith.divf %281, %282 : vector<2x128xf32>
    %284 = math.tanh %278 : vector<2x128xf32>
    %285 = vector.extract_strided_slice %283 {offsets = [0, 0], sizes = [2, 32], strides = [1, 1]} : vector<2x128xf32> to vector<2x32xf32>
    %286 = vector.extract_strided_slice %283 {offsets = [0, 32], sizes = [2, 32], strides = [1, 1]} : vector<2x128xf32> to vector<2x32xf32>
    %287 = vector.extract_strided_slice %284 {offsets = [0, 64], sizes = [2, 32], strides = [1, 1]} : vector<2x128xf32> to vector<2x32xf32>
    %288 = vector.extract_strided_slice %283 {offsets = [0, 96], sizes = [2, 32], strides = [1, 1]} : vector<2x128xf32> to vector<2x32xf32>
    %289 = arith.mulf %286, %267 : vector<2x32xf32>
    %290 = arith.mulf %285, %287 : vector<2x32xf32>
    %291 = arith.addf %289, %290 : vector<2x32xf32>
    %292 = math.tanh %291 : vector<2x32xf32>
    %293 = arith.mulf %288, %292 : vector<2x32xf32>
    %294 = tpu.concatenate %267, %291 in 1 : vector<2x32xf32>, vector<2x32xf32> -> vector<2x64xf32>
    %cst_82 = arith.constant dense<0.000000e+00> : vector<2x32xf32>
    %295 = tpu.matmul %294, %4, %cst_82 {dimension_numbers = #tpu.dot_dimension_numbers<[1], [0], [0], [1], [0, 0, 1, 1], [], []>} : vector<2x64xf32>, vector<64x32xf32>, vector<2x32xf32> -> vector<2x32xf32>
    %296 = arith.addf %295, %7 : vector<2x32xf32>
    %cst_83 = arith.constant 0.000000e+00 : f32
    %297 = vector.broadcast %cst_83 : f32 to vector<2x32xf32>
    %298 = arith.cmpf oge, %296, %297 : vector<2x32xf32>
    %cst_84 = arith.constant 0.00999999977 : f32
    %299 = vector.broadcast %cst_84 : f32 to vector<2x32xf32>
    %300 = arith.mulf %299, %296 : vector<2x32xf32>
    %301 = arith.select %298, %296, %300 : vector<2x32xi1>, vector<2x32xf32>
    %302 = vector.extract_strided_slice %301 {offsets = [0, 0], sizes = [2, 16], strides = [1, 1]} : vector<2x32xf32> to vector<2x16xf32>
    %303 = arith.mulf %302, %10 : vector<2x16xf32>
    %cst_85 = arith.constant dense<0.000000e+00> : vector<2xf32>
    %304 = vector.multi_reduction <add>, %303, %cst_85 [1] : vector<2x16xf32> to vector<2xf32>
    %305 = vector.shape_cast %304 : vector<2xf32> to vector<2x1xf32>
    %306 = arith.addf %305, %17 : vector<2x1xf32>
    %307 = arith.negf %306 : vector<2x1xf32>
    %308 = math.exp %307 : vector<2x1xf32>
    %cst_86 = arith.constant 1.000000e+00 : f32
    %309 = vector.broadcast %cst_86 : f32 to vector<2x1xf32>
    %310 = arith.addf %309, %308 : vector<2x1xf32>
    %311 = arith.divf %309, %310 : vector<2x1xf32>
    %312 = vector.extract_strided_slice %301 {offsets = [0, 16], sizes = [2, 16], strides = [1, 1]} : vector<2x32xf32> to vector<2x16xf32>
    %313 = arith.mulf %312, %13 : vector<2x16xf32>
    %cst_87 = arith.constant dense<0.000000e+00> : vector<2xf32>
    %314 = vector.multi_reduction <add>, %313, %cst_87 [1] : vector<2x16xf32> to vector<2xf32>
    %315 = vector.shape_cast %314 : vector<2xf32> to vector<2x1xf32>
    %316 = arith.addf %315, %18 : vector<2x1xf32>
    %317 = arith.negf %316 : vector<2x1xf32>
    %318 = math.exp %317 : vector<2x1xf32>
    %cst_88 = arith.constant 1.000000e+00 : f32
    %319 = vector.broadcast %cst_88 : f32 to vector<2x1xf32>
    %320 = arith.addf %319, %318 : vector<2x1xf32>
    %321 = arith.divf %319, %320 : vector<2x1xf32>
    %cst_89 = arith.constant 1.000000e+00 : f32
    %322 = vector.broadcast %cst_89 : f32 to vector<2x1xf32>
    %323 = arith.subf %322, %269 : vector<2x1xf32>
    %324 = arith.minimumf %311, %323 : vector<2x1xf32>
    %325 = arith.addf %269, %324 : vector<2x1xf32>
    %326 = arith.cmpf ogt, %325, %321 : vector<2x1xf32>
    %327 = vector.shape_cast %326 : vector<2x1xi1> to vector<2x1xi1>
    %328 = vector.broadcast %327 : vector<2x1xi1> to vector<2x32xi1>
    %329 = arith.select %328, %293, %266 : vector<2x32xi1>, vector<2x32xf32>
    %330 = arith.select %328, %291, %267 : vector<2x32xi1>, vector<2x32xf32>
    %cst_90 = arith.constant 0.000000e+00 : f32
    %331 = vector.broadcast %cst_90 : f32 to vector<2x1xf32>
    %332 = arith.select %326, %331, %325 : vector<2x1xi1>, vector<2x1xf32>
    %333 = arith.index_cast %c4_i32 : i32 to index
    %c0_91 = arith.constant 0 : index
    %c0_92 = arith.constant 0 : index
    %334 = vector.load %arg9[%333, %c0_91, %c0_92] : memref<8x2x32xf32, #tpu.memory_space<vmem>>, vector<1x2x32xf32>
    %335 = vector.shape_cast %334 : vector<1x2x32xf32> to vector<2x32xf32>
    %336 = vector.shape_cast %329 : vector<2x32xf32> to vector<1x2x32xf32>
    tpu.vector_store %arg9[%333, %c0_91, %c0_92], %336 {strides = array<i32>} : memref<8x2x32xf32, #tpu.memory_space<vmem>>, vector<1x2x32xf32>,
    %c5_i32 = arith.constant 5 : i32
    %337 = arith.index_cast %c5_i32 : i32 to index
    %c0_93 = arith.constant 0 : index
    %c0_94 = arith.constant 0 : index
    %338 = vector.load %arg2[%337, %c0_93, %c0_94] : memref<8x2x128xf32, #tpu.memory_space<vmem>>, vector<1x2x128xf32>
    %339 = vector.shape_cast %338 : vector<1x2x128xf32> to vector<2x128xf32>
    %cst_95 = arith.constant dense<0.000000e+00> : vector<2x128xf32>
    %340 = tpu.matmul %329, %3, %cst_95 {dimension_numbers = #tpu.dot_dimension_numbers<[1], [0], [0], [1], [0, 0, 1, 1], [], []>} : vector<2x32xf32>, vector<32x128xf32>, vector<2x128xf32> -> vector<2x128xf32>
    %341 = arith.addf %339, %340 : vector<2x128xf32>
    %342 = arith.negf %341 : vector<2x128xf32>
    %343 = math.exp %342 : vector<2x128xf32>
    %cst_96 = arith.constant 1.000000e+00 : f32
    %344 = vector.broadcast %cst_96 : f32 to vector<2x128xf32>
    %345 = arith.addf %344, %343 : vector<2x128xf32>
    %346 = arith.divf %344, %345 : vector<2x128xf32>
    %347 = math.tanh %341 : vector<2x128xf32>
    %348 = vector.extract_strided_slice %346 {offsets = [0, 0], sizes = [2, 32], strides = [1, 1]} : vector<2x128xf32> to vector<2x32xf32>
    %349 = vector.extract_strided_slice %346 {offsets = [0, 32], sizes = [2, 32], strides = [1, 1]} : vector<2x128xf32> to vector<2x32xf32>
    %350 = vector.extract_strided_slice %347 {offsets = [0, 64], sizes = [2, 32], strides = [1, 1]} : vector<2x128xf32> to vector<2x32xf32>
    %351 = vector.extract_strided_slice %346 {offsets = [0, 96], sizes = [2, 32], strides = [1, 1]} : vector<2x128xf32> to vector<2x32xf32>
    %352 = arith.mulf %349, %330 : vector<2x32xf32>
    %353 = arith.mulf %348, %350 : vector<2x32xf32>
    %354 = arith.addf %352, %353 : vector<2x32xf32>
    %355 = math.tanh %354 : vector<2x32xf32>
    %356 = arith.mulf %351, %355 : vector<2x32xf32>
    %357 = tpu.concatenate %330, %354 in 1 : vector<2x32xf32>, vector<2x32xf32> -> vector<2x64xf32>
    %cst_97 = arith.constant dense<0.000000e+00> : vector<2x32xf32>
    %358 = tpu.matmul %357, %4, %cst_97 {dimension_numbers = #tpu.dot_dimension_numbers<[1], [0], [0], [1], [0, 0, 1, 1], [], []>} : vector<2x64xf32>, vector<64x32xf32>, vector<2x32xf32> -> vector<2x32xf32>
    %359 = arith.addf %358, %7 : vector<2x32xf32>
    %cst_98 = arith.constant 0.000000e+00 : f32
    %360 = vector.broadcast %cst_98 : f32 to vector<2x32xf32>
    %361 = arith.cmpf oge, %359, %360 : vector<2x32xf32>
    %cst_99 = arith.constant 0.00999999977 : f32
    %362 = vector.broadcast %cst_99 : f32 to vector<2x32xf32>
    %363 = arith.mulf %362, %359 : vector<2x32xf32>
    %364 = arith.select %361, %359, %363 : vector<2x32xi1>, vector<2x32xf32>
    %365 = vector.extract_strided_slice %364 {offsets = [0, 0], sizes = [2, 16], strides = [1, 1]} : vector<2x32xf32> to vector<2x16xf32>
    %366 = arith.mulf %365, %10 : vector<2x16xf32>
    %cst_100 = arith.constant dense<0.000000e+00> : vector<2xf32>
    %367 = vector.multi_reduction <add>, %366, %cst_100 [1] : vector<2x16xf32> to vector<2xf32>
    %368 = vector.shape_cast %367 : vector<2xf32> to vector<2x1xf32>
    %369 = arith.addf %368, %17 : vector<2x1xf32>
    %370 = arith.negf %369 : vector<2x1xf32>
    %371 = math.exp %370 : vector<2x1xf32>
    %cst_101 = arith.constant 1.000000e+00 : f32
    %372 = vector.broadcast %cst_101 : f32 to vector<2x1xf32>
    %373 = arith.addf %372, %371 : vector<2x1xf32>
    %374 = arith.divf %372, %373 : vector<2x1xf32>
    %375 = vector.extract_strided_slice %364 {offsets = [0, 16], sizes = [2, 16], strides = [1, 1]} : vector<2x32xf32> to vector<2x16xf32>
    %376 = arith.mulf %375, %13 : vector<2x16xf32>
    %cst_102 = arith.constant dense<0.000000e+00> : vector<2xf32>
    %377 = vector.multi_reduction <add>, %376, %cst_102 [1] : vector<2x16xf32> to vector<2xf32>
    %378 = vector.shape_cast %377 : vector<2xf32> to vector<2x1xf32>
    %379 = arith.addf %378, %18 : vector<2x1xf32>
    %380 = arith.negf %379 : vector<2x1xf32>
    %381 = math.exp %380 : vector<2x1xf32>
    %cst_103 = arith.constant 1.000000e+00 : f32
    %382 = vector.broadcast %cst_103 : f32 to vector<2x1xf32>
    %383 = arith.addf %382, %381 : vector<2x1xf32>
    %384 = arith.divf %382, %383 : vector<2x1xf32>
    %cst_104 = arith.constant 1.000000e+00 : f32
    %385 = vector.broadcast %cst_104 : f32 to vector<2x1xf32>
    %386 = arith.subf %385, %332 : vector<2x1xf32>
    %387 = arith.minimumf %374, %386 : vector<2x1xf32>
    %388 = arith.addf %332, %387 : vector<2x1xf32>
    %389 = arith.cmpf ogt, %388, %384 : vector<2x1xf32>
    %390 = vector.shape_cast %389 : vector<2x1xi1> to vector<2x1xi1>
    %391 = vector.broadcast %390 : vector<2x1xi1> to vector<2x32xi1>
    %392 = arith.select %391, %356, %329 : vector<2x32xi1>, vector<2x32xf32>
    %393 = arith.select %391, %354, %330 : vector<2x32xi1>, vector<2x32xf32>
    %cst_105 = arith.constant 0.000000e+00 : f32
    %394 = vector.broadcast %cst_105 : f32 to vector<2x1xf32>
    %395 = arith.select %389, %394, %388 : vector<2x1xi1>, vector<2x1xf32>
    %396 = arith.index_cast %c5_i32 : i32 to index
    %c0_106 = arith.constant 0 : index
    %c0_107 = arith.constant 0 : index
    %397 = vector.load %arg9[%396, %c0_106, %c0_107] : memref<8x2x32xf32, #tpu.memory_space<vmem>>, vector<1x2x32xf32>
    %398 = vector.shape_cast %397 : vector<1x2x32xf32> to vector<2x32xf32>
    %399 = vector.shape_cast %392 : vector<2x32xf32> to vector<1x2x32xf32>
    tpu.vector_store %arg9[%396, %c0_106, %c0_107], %399 {strides = array<i32>} : memref<8x2x32xf32, #tpu.memory_space<vmem>>, vector<1x2x32xf32>,
    %c6_i32 = arith.constant 6 : i32
    %400 = arith.index_cast %c6_i32 : i32 to index
    %c0_108 = arith.constant 0 : index
    %c0_109 = arith.constant 0 : index
    %401 = vector.load %arg2[%400, %c0_108, %c0_109] : memref<8x2x128xf32, #tpu.memory_space<vmem>>, vector<1x2x128xf32>
    %402 = vector.shape_cast %401 : vector<1x2x128xf32> to vector<2x128xf32>
    %cst_110 = arith.constant dense<0.000000e+00> : vector<2x128xf32>
    %403 = tpu.matmul %392, %3, %cst_110 {dimension_numbers = #tpu.dot_dimension_numbers<[1], [0], [0], [1], [0, 0, 1, 1], [], []>} : vector<2x32xf32>, vector<32x128xf32>, vector<2x128xf32> -> vector<2x128xf32>
    %404 = arith.addf %402, %403 : vector<2x128xf32>
    %405 = arith.negf %404 : vector<2x128xf32>
    %406 = math.exp %405 : vector<2x128xf32>
    %cst_111 = arith.constant 1.000000e+00 : f32
    %407 = vector.broadcast %cst_111 : f32 to vector<2x128xf32>
    %408 = arith.addf %407, %406 : vector<2x128xf32>
    %409 = arith.divf %407, %408 : vector<2x128xf32>
    %410 = math.tanh %404 : vector<2x128xf32>
    %411 = vector.extract_strided_slice %409 {offsets = [0, 0], sizes = [2, 32], strides = [1, 1]} : vector<2x128xf32> to vector<2x32xf32>
    %412 = vector.extract_strided_slice %409 {offsets = [0, 32], sizes = [2, 32], strides = [1, 1]} : vector<2x128xf32> to vector<2x32xf32>
    %413 = vector.extract_strided_slice %410 {offsets = [0, 64], sizes = [2, 32], strides = [1, 1]} : vector<2x128xf32> to vector<2x32xf32>
    %414 = vector.extract_strided_slice %409 {offsets = [0, 96], sizes = [2, 32], strides = [1, 1]} : vector<2x128xf32> to vector<2x32xf32>
    %415 = arith.mulf %412, %393 : vector<2x32xf32>
    %416 = arith.mulf %411, %413 : vector<2x32xf32>
    %417 = arith.addf %415, %416 : vector<2x32xf32>
    %418 = math.tanh %417 : vector<2x32xf32>
    %419 = arith.mulf %414, %418 : vector<2x32xf32>
    %420 = tpu.concatenate %393, %417 in 1 : vector<2x32xf32>, vector<2x32xf32> -> vector<2x64xf32>
    %cst_112 = arith.constant dense<0.000000e+00> : vector<2x32xf32>
    %421 = tpu.matmul %420, %4, %cst_112 {dimension_numbers = #tpu.dot_dimension_numbers<[1], [0], [0], [1], [0, 0, 1, 1], [], []>} : vector<2x64xf32>, vector<64x32xf32>, vector<2x32xf32> -> vector<2x32xf32>
    %422 = arith.addf %421, %7 : vector<2x32xf32>
    %cst_113 = arith.constant 0.000000e+00 : f32
    %423 = vector.broadcast %cst_113 : f32 to vector<2x32xf32>
    %424 = arith.cmpf oge, %422, %423 : vector<2x32xf32>
    %cst_114 = arith.constant 0.00999999977 : f32
    %425 = vector.broadcast %cst_114 : f32 to vector<2x32xf32>
    %426 = arith.mulf %425, %422 : vector<2x32xf32>
    %427 = arith.select %424, %422, %426 : vector<2x32xi1>, vector<2x32xf32>
    %428 = vector.extract_strided_slice %427 {offsets = [0, 0], sizes = [2, 16], strides = [1, 1]} : vector<2x32xf32> to vector<2x16xf32>
    %429 = arith.mulf %428, %10 : vector<2x16xf32>
    %cst_115 = arith.constant dense<0.000000e+00> : vector<2xf32>
    %430 = vector.multi_reduction <add>, %429, %cst_115 [1] : vector<2x16xf32> to vector<2xf32>
    %431 = vector.shape_cast %430 : vector<2xf32> to vector<2x1xf32>
    %432 = arith.addf %431, %17 : vector<2x1xf32>
    %433 = arith.negf %432 : vector<2x1xf32>
    %434 = math.exp %433 : vector<2x1xf32>
    %cst_116 = arith.constant 1.000000e+00 : f32
    %435 = vector.broadcast %cst_116 : f32 to vector<2x1xf32>
    %436 = arith.addf %435, %434 : vector<2x1xf32>
    %437 = arith.divf %435, %436 : vector<2x1xf32>
    %438 = vector.extract_strided_slice %427 {offsets = [0, 16], sizes = [2, 16], strides = [1, 1]} : vector<2x32xf32> to vector<2x16xf32>
    %439 = arith.mulf %438, %13 : vector<2x16xf32>
    %cst_117 = arith.constant dense<0.000000e+00> : vector<2xf32>
    %440 = vector.multi_reduction <add>, %439, %cst_117 [1] : vector<2x16xf32> to vector<2xf32>
    %441 = vector.shape_cast %440 : vector<2xf32> to vector<2x1xf32>
    %442 = arith.addf %441, %18 : vector<2x1xf32>
    %443 = arith.negf %442 : vector<2x1xf32>
    %444 = math.exp %443 : vector<2x1xf32>
    %cst_118 = arith.constant 1.000000e+00 : f32
    %445 = vector.broadcast %cst_118 : f32 to vector<2x1xf32>
    %446 = arith.addf %445, %444 : vector<2x1xf32>
    %447 = arith.divf %445, %446 : vector<2x1xf32>
    %cst_119 = arith.constant 1.000000e+00 : f32
    %448 = vector.broadcast %cst_119 : f32 to vector<2x1xf32>
    %449 = arith.subf %448, %395 : vector<2x1xf32>
    %450 = arith.minimumf %437, %449 : vector<2x1xf32>
    %451 = arith.addf %395, %450 : vector<2x1xf32>
    %452 = arith.cmpf ogt, %451, %447 : vector<2x1xf32>
    %453 = vector.shape_cast %452 : vector<2x1xi1> to vector<2x1xi1>
    %454 = vector.broadcast %453 : vector<2x1xi1> to vector<2x32xi1>
    %455 = arith.select %454, %419, %392 : vector<2x32xi1>, vector<2x32xf32>
    %456 = arith.select %454, %417, %393 : vector<2x32xi1>, vector<2x32xf32>
    %cst_120 = arith.constant 0.000000e+00 : f32
    %457 = vector.broadcast %cst_120 : f32 to vector<2x1xf32>
    %458 = arith.select %452, %457, %451 : vector<2x1xi1>, vector<2x1xf32>
    %459 = arith.index_cast %c6_i32 : i32 to index
    %c0_121 = arith.constant 0 : index
    %c0_122 = arith.constant 0 : index
    %460 = vector.load %arg9[%459, %c0_121, %c0_122] : memref<8x2x32xf32, #tpu.memory_space<vmem>>, vector<1x2x32xf32>
    %461 = vector.shape_cast %460 : vector<1x2x32xf32> to vector<2x32xf32>
    %462 = vector.shape_cast %455 : vector<2x32xf32> to vector<1x2x32xf32>
    tpu.vector_store %arg9[%459, %c0_121, %c0_122], %462 {strides = array<i32>} : memref<8x2x32xf32, #tpu.memory_space<vmem>>, vector<1x2x32xf32>,
    %c7_i32 = arith.constant 7 : i32
    %463 = arith.index_cast %c7_i32 : i32 to index
    %c0_123 = arith.constant 0 : index
    %c0_124 = arith.constant 0 : index
    %464 = vector.load %arg2[%463, %c0_123, %c0_124] : memref<8x2x128xf32, #tpu.memory_space<vmem>>, vector<1x2x128xf32>
    %465 = vector.shape_cast %464 : vector<1x2x128xf32> to vector<2x128xf32>
    %cst_125 = arith.constant dense<0.000000e+00> : vector<2x128xf32>
    %466 = tpu.matmul %455, %3, %cst_125 {dimension_numbers = #tpu.dot_dimension_numbers<[1], [0], [0], [1], [0, 0, 1, 1], [], []>} : vector<2x32xf32>, vector<32x128xf32>, vector<2x128xf32> -> vector<2x128xf32>
    %467 = arith.addf %465, %466 : vector<2x128xf32>
    %468 = arith.negf %467 : vector<2x128xf32>
    %469 = math.exp %468 : vector<2x128xf32>
    %cst_126 = arith.constant 1.000000e+00 : f32
    %470 = vector.broadcast %cst_126 : f32 to vector<2x128xf32>
    %471 = arith.addf %470, %469 : vector<2x128xf32>
    %472 = arith.divf %470, %471 : vector<2x128xf32>
    %473 = math.tanh %467 : vector<2x128xf32>
    %474 = vector.extract_strided_slice %472 {offsets = [0, 0], sizes = [2, 32], strides = [1, 1]} : vector<2x128xf32> to vector<2x32xf32>
    %475 = vector.extract_strided_slice %472 {offsets = [0, 32], sizes = [2, 32], strides = [1, 1]} : vector<2x128xf32> to vector<2x32xf32>
    %476 = vector.extract_strided_slice %473 {offsets = [0, 64], sizes = [2, 32], strides = [1, 1]} : vector<2x128xf32> to vector<2x32xf32>
    %477 = vector.extract_strided_slice %472 {offsets = [0, 96], sizes = [2, 32], strides = [1, 1]} : vector<2x128xf32> to vector<2x32xf32>
    %478 = arith.mulf %475, %456 : vector<2x32xf32>
    %479 = arith.mulf %474, %476 : vector<2x32xf32>
    %480 = arith.addf %478, %479 : vector<2x32xf32>
    %481 = math.tanh %480 : vector<2x32xf32>
    %482 = arith.mulf %477, %481 : vector<2x32xf32>
    %483 = tpu.concatenate %456, %480 in 1 : vector<2x32xf32>, vector<2x32xf32> -> vector<2x64xf32>
    %cst_127 = arith.constant dense<0.000000e+00> : vector<2x32xf32>
    %484 = tpu.matmul %483, %4, %cst_127 {dimension_numbers = #tpu.dot_dimension_numbers<[1], [0], [0], [1], [0, 0, 1, 1], [], []>} : vector<2x64xf32>, vector<64x32xf32>, vector<2x32xf32> -> vector<2x32xf32>
    %485 = arith.addf %484, %7 : vector<2x32xf32>
    %cst_128 = arith.constant 0.000000e+00 : f32
    %486 = vector.broadcast %cst_128 : f32 to vector<2x32xf32>
    %487 = arith.cmpf oge, %485, %486 : vector<2x32xf32>
    %cst_129 = arith.constant 0.00999999977 : f32
    %488 = vector.broadcast %cst_129 : f32 to vector<2x32xf32>
    %489 = arith.mulf %488, %485 : vector<2x32xf32>
    %490 = arith.select %487, %485, %489 : vector<2x32xi1>, vector<2x32xf32>
    %491 = vector.extract_strided_slice %490 {offsets = [0, 0], sizes = [2, 16], strides = [1, 1]} : vector<2x32xf32> to vector<2x16xf32>
    %492 = arith.mulf %491, %10 : vector<2x16xf32>
    %cst_130 = arith.constant dense<0.000000e+00> : vector<2xf32>
    %493 = vector.multi_reduction <add>, %492, %cst_130 [1] : vector<2x16xf32> to vector<2xf32>
    %494 = vector.shape_cast %493 : vector<2xf32> to vector<2x1xf32>
    %495 = arith.addf %494, %17 : vector<2x1xf32>
    %496 = arith.negf %495 : vector<2x1xf32>
    %497 = math.exp %496 : vector<2x1xf32>
    %cst_131 = arith.constant 1.000000e+00 : f32
    %498 = vector.broadcast %cst_131 : f32 to vector<2x1xf32>
    %499 = arith.addf %498, %497 : vector<2x1xf32>
    %500 = arith.divf %498, %499 : vector<2x1xf32>
    %501 = vector.extract_strided_slice %490 {offsets = [0, 16], sizes = [2, 16], strides = [1, 1]} : vector<2x32xf32> to vector<2x16xf32>
    %502 = arith.mulf %501, %13 : vector<2x16xf32>
    %cst_132 = arith.constant dense<0.000000e+00> : vector<2xf32>
    %503 = vector.multi_reduction <add>, %502, %cst_132 [1] : vector<2x16xf32> to vector<2xf32>
    %504 = vector.shape_cast %503 : vector<2xf32> to vector<2x1xf32>
    %505 = arith.addf %504, %18 : vector<2x1xf32>
    %506 = arith.negf %505 : vector<2x1xf32>
    %507 = math.exp %506 : vector<2x1xf32>
    %cst_133 = arith.constant 1.000000e+00 : f32
    %508 = vector.broadcast %cst_133 : f32 to vector<2x1xf32>
    %509 = arith.addf %508, %507 : vector<2x1xf32>
    %510 = arith.divf %508, %509 : vector<2x1xf32>
    %cst_134 = arith.constant 1.000000e+00 : f32
    %511 = vector.broadcast %cst_134 : f32 to vector<2x1xf32>
    %512 = arith.subf %511, %458 : vector<2x1xf32>
    %513 = arith.minimumf %500, %512 : vector<2x1xf32>
    %514 = arith.addf %458, %513 : vector<2x1xf32>
    %515 = arith.cmpf ogt, %514, %510 : vector<2x1xf32>
    %516 = vector.shape_cast %515 : vector<2x1xi1> to vector<2x1xi1>
    %517 = vector.broadcast %516 : vector<2x1xi1> to vector<2x32xi1>
    %518 = arith.select %517, %482, %455 : vector<2x32xi1>, vector<2x32xf32>
    %519 = arith.select %517, %480, %456 : vector<2x32xi1>, vector<2x32xf32>
    %cst_135 = arith.constant 0.000000e+00 : f32
    %520 = vector.broadcast %cst_135 : f32 to vector<2x1xf32>
    %521 = arith.select %515, %520, %514 : vector<2x1xi1>, vector<2x1xf32>
    %522 = arith.index_cast %c7_i32 : i32 to index
    %c0_136 = arith.constant 0 : index
    %c0_137 = arith.constant 0 : index
    %523 = vector.load %arg9[%522, %c0_136, %c0_137] : memref<8x2x32xf32, #tpu.memory_space<vmem>>, vector<1x2x32xf32>
    %524 = vector.shape_cast %523 : vector<1x2x32xf32> to vector<2x32xf32>
    %525 = vector.shape_cast %518 : vector<2x32xf32> to vector<1x2x32xf32>
    tpu.vector_store %arg9[%522, %c0_136, %c0_137], %525 {strides = array<i32>} : memref<8x2x32xf32, #tpu.memory_space<vmem>>, vector<1x2x32xf32>,
    %c8_i32 = arith.constant 8 : i32
    %c0_138 = arith.constant 0 : index
    %c0_139 = arith.constant 0 : index
    %526 = vector.load %arg11[%c0_138, %c0_139] : memref<2x32xf32, #tpu.memory_space<vmem>>, vector<2x32xf32>
    tpu.vector_store %arg11[%c0_138, %c0_139], %518 {strides = array<i32>} : memref<2x32xf32, #tpu.memory_space<vmem>>, vector<2x32xf32>,
    %c0_140 = arith.constant 0 : index
    %c0_141 = arith.constant 0 : index
    %527 = vector.load %arg12[%c0_140, %c0_141] : memref<2x32xf32, #tpu.memory_space<vmem>>, vector<2x32xf32>
    tpu.vector_store %arg12[%c0_140, %c0_141], %519 {strides = array<i32>} : memref<2x32xf32, #tpu.memory_space<vmem>>, vector<2x32xf32>,
    %c0_142 = arith.constant 0 : index
    %c0_143 = arith.constant 0 : index
    %528 = vector.load %arg13[%c0_142, %c0_143] : memref<2x1xf32, #tpu.memory_space<vmem>>, vector<2x1xf32>
    tpu.vector_store %arg13[%c0_142, %c0_143], %521 {strides = array<i32>} : memref<2x1xf32, #tpu.memory_space<vmem>>, vector<2x1xf32>,
    %c0_i32_144 = arith.constant 0 : i32
    %529 = arith.cmpi eq, %arg1, %c0_i32_144 : i32
    %530 = arith.extui %529 : i1 to i32
    %c0_i32_145 = arith.constant 0 : i32
    %531 = arith.cmpi ne, %530, %c0_i32_145 : i32
    scf.if %531 {
      %c0_146 = arith.constant 0 : index
      %c0_147 = arith.constant 0 : index
      %c0_148 = arith.constant 0 : index
      %532 = vector.load %arg10[%c0_146, %c0_147, %c0_148] : memref<1x2x32xf32, #tpu.memory_space<vmem>>, vector<1x2x32xf32>
      %533 = vector.shape_cast %532 : vector<1x2x32xf32> to vector<2x32xf32>
      %534 = vector.shape_cast %519 : vector<2x32xf32> to vector<1x2x32xf32>
      tpu.vector_store %arg10[%c0_146, %c0_147, %c0_148], %534 {strides = array<i32>} : memref<1x2x32xf32, #tpu.memory_space<vmem>>, vector<1x2x32xf32>,
    } else {
    }
    return
  }
  func.func @transform_0(%arg0: i32, %arg1: i32) -> (i32, i32, i32) {
    %c0_i32 = arith.constant 0 : i32
    %c0_i32_0 = arith.constant 0 : i32
    return %arg1, %arg0, %c0_i32 : i32, i32, i32
  }
  func.func @transform_1(%arg0: i32, %arg1: i32) -> (i32, i32) {
    %c0_i32 = arith.constant 0 : i32
    %c0_i32_0 = arith.constant 0 : i32
    %c0_i32_1 = arith.constant 0 : i32
    return %c0_i32, %c0_i32_0 : i32, i32
  }
  func.func @transform_2(%arg0: i32, %arg1: i32) -> (i32, i32) {
    %c0_i32 = arith.constant 0 : i32
    %c0_i32_0 = arith.constant 0 : i32
    %c0_i32_1 = arith.constant 0 : i32
    return %c0_i32, %c0_i32_0 : i32, i32
  }
  func.func @transform_3(%arg0: i32, %arg1: i32) -> (i32, i32) {
    %c0_i32 = arith.constant 0 : i32
    %c0_i32_0 = arith.constant 0 : i32
    %c0_i32_1 = arith.constant 0 : i32
    return %c0_i32, %c0_i32_0 : i32, i32
  }
  func.func @transform_4(%arg0: i32, %arg1: i32) -> (i32, i32) {
    %c0_i32 = arith.constant 0 : i32
    %c0_i32_0 = arith.constant 0 : i32
    %c0_i32_1 = arith.constant 0 : i32
    return %c0_i32, %c0_i32_0 : i32, i32
  }
  func.func @transform_5(%arg0: i32, %arg1: i32) -> (i32, i32) {
    %c0_i32 = arith.constant 0 : i32
    %c0_i32_0 = arith.constant 0 : i32
    %c0_i32_1 = arith.constant 0 : i32
    return %c0_i32, %c0_i32_0 : i32, i32
  }
  func.func @transform_6(%arg0: i32, %arg1: i32) -> (i32, i32) {
    %c0_i32 = arith.constant 0 : i32
    %c0_i32_0 = arith.constant 0 : i32
    %c0_i32_1 = arith.constant 0 : i32
    return %c0_i32, %c0_i32_0 : i32, i32
  }
  func.func @transform_7(%arg0: i32, %arg1: i32) -> (i32, i32, i32) {
    %c0_i32 = arith.constant 0 : i32
    %c0_i32_0 = arith.constant 0 : i32
    return %arg1, %arg0, %c0_i32 : i32, i32, i32
  }
  func.func @transform_8(%arg0: i32, %arg1: i32) -> (i32, i32, i32) {
    %c0_i32 = arith.constant 0 : i32
    %c0_i32_0 = arith.constant 0 : i32
    %c0_i32_1 = arith.constant 0 : i32
    return %c0_i32, %arg0, %c0_i32_0 : i32, i32, i32
  }
}

</mosaic_0001>

<bundles_post_ra>
// kernel: tpu_custom_call.1
= control target key start
LH: loop header
LB: loop body
LE: loop exit
PB: predicated region body
PF: predicated region fallthrough
CT: control target
= control target key end

     0   :  { %14 = vsyncpa [#allocation6], 0  ;;  %vm34_vm0 = vcmask 254976   ;;  %v2561_v1 = vmov 0.0   ;;  %vm2562_vm1 = vmmov 0   ;;  %s3341_s0 = inlined_call_operand.vmem [shape: f32[8,2,128], index: 0, kind: input, shape index: {}]   ;;  %s3342_s1 = inlined_call_operand.vmem [shape: f32[32,128], index: 1, kind: input, shape index: {}]   ;;  %s3343_s2 = inlined_call_operand.vmem [shape: f32[64,32], index: 2, kind: input, shape index: {}]   ;;  %s3344_s3 = inlined_call_operand.vmem [shape: f32[1,32], index: 3, kind: input, shape index: {}]   ;;  %s3345_s4 = inlined_call_operand.vmem [shape: f32[1,16], index: 4, kind: input, shape index: {}]   ;;  %s3346_s5 = inlined_call_operand.vmem [shape: f32[1,16], index: 5, kind: input, shape index: {}]   ;;  %s3347_s6 = inlined_call_operand.vmem [shape: f32[1,2], index: 6, kind: input, shape index: {}]   ;;  %s3348_s7 = inlined_call_operand.hbm [shape: f32[8,2,32], index: 7, kind: output, shape index: {0}]   ;;  %s3349_s8 = inlined_call_operand.hbm [shape: f32[1,2,32], index: 8, kind: output, shape index: {1}]  }
   0x1   :  { %v2622_v0 = vld [vmem:[%s3342_s1 + $0x18] sm:$0xff]  ;;  %2119 = vmatprep.subr.mxu1 %v2561_v1  ;;  %v2628_v2 = vld [vmem:[%s3342_s1 + $0x10] sm:$0xff]  ;;  %2127 = vmatprep.mubr.msk.f32.mxu1 %vm2562_vm1, %v2561_v1  ;;  %35 = vst.msk [vmem:[#allocation2] sm:$0x3] %vm34_vm0, %v2561_v1  ;;  %36 = vst.msk [vmem:[#allocation3] sm:$0x3] %vm34_vm0, %v2561_v1 }
   0x2   :  { %15 = vsyncpa [#allocation8], 0  ;;  %2120 = vmatpush3.msra.mxu1 %v2622_v0  ;;  %2149 = vmatprep.subr.mxu0 %v2561_v1  ;;  %v2642_v3 = vld [vmem:[%s3342_s1 + $0x8] sm:$0xff]  ;;  %v2651_v4 = vld [vmem:[%s3342_s1] sm:$0xff]  ;;  %vm82_vm2 = vcmask 261120   ;;  %s2563_s27 = smov 64  }
   0x3   :  { %2121 = vmatprep.subr.mxu1 %v2561_v1  ;;  %2150 = vmatpush3.msra.mxu0 %v2622_v0  ;;  %v81_v6 = vld [vmem:[%s3341_s0] sm:$0x3]  ;;  %v2677_v10 = vld [vmem:[%s3343_s2 + $0x38] sm:$0xff]  ;;  %v2682_v11 = vld [vmem:[%s3343_s2 + $0x30] sm:$0xff]  ;;  %s2564_s28 = smov 32   ;;  %s2565_s13 = smov 16  }
   0x4   :  { %2122 = vmatpush3.msra.mxu1 %v2628_v2  ;;  %2151 = vmatprep.subr.mxu0 %v2561_v1  ;;  %v2689_v12 = vld [vmem:[%s3343_s2 + $0x28] sm:$0xff]  ;;  %v2696_v13 = vld [vmem:[%s3343_s2 + $0x20] sm:$0xff]  ;;  %v2703_v14 = vld [vmem:[%s3343_s2 + $0x18] sm:$0xff]  ;;  %vm186_vm3 = vcmask 523264   ;;  %s2566_s15 = smov 112   ;;  %vm264_vm5 = vcmask 123904  }
   0x5   :  { %2123 = vmatprep.subr.mxu1 %v2561_v1  ;;  %2152 = vmatpush3.msra.mxu0 %v2628_v2  ;;  %v2710_v16 = vld [vmem:[%s3343_s2 + $0x10] sm:$0xff]  ;;  %v2721_v21 = vld [vmem:[%s3343_s2 + $0x8] sm:$0xff]  ;;  %v2728_v22 = vld [vmem:[%s3343_s2] sm:$0xff]  ;;  %vm37_vm6 = vcmask 1024   ;;  %v2567_v43 = vmov 1.0   ;;  %v2568_v46 = vmov 0  }
   0x6   :  { %2124 = vmatpush3.msra.mxu1 %v2642_v3  ;;  %2153 = vmatprep.subr.mxu0 %v2561_v1  ;;  %v1958_v26 = vld [vmem:[%s3346_s5] ss:$0 sm:$0xff]  ;;  %38 = vst.msk [vmem:[#allocation4] sm:$0x3] %vm37_vm6, %v2567_v43  ;;  %s2569_s20 = smov 127   ;;  %s2570_s21 = smov 96  }
   0x7   :  { %2125 = vmatprep.subr.mxu1 %v2561_v1  ;;  %2154 = vmatpush3.msra.mxu0 %v2642_v3  ;;  %v2761_v32 = vld [vmem:[%s3344_s3] ss:$0 sm:$0xff] }
   0x8   :  { %2126 = vmatpush3.msra.mxu1 %v2651_v4  ;;  %v2659_v5 = vld [vmem:[#allocation2] sm:$0x3]  ;;  %2155 = vmatprep.subr.mxu0 %v2561_v1  ;;  %v79_v17 = vld [vmem:[#allocation3] sm:$0x3] }
   0x9   :  { %2128 = vmatmul.mubr.msk.f32.vlgmr.msra.gmra.mxu1 %vm82_vm2, %v2659_v5  ;;  %2130 = vmatprep.subr.mxu1 %v2561_v1  ;;  %v2771_v40 = vld [vmem:[%s3345_s4] ss:$0 sm:$0xff] }
   0xa   :  { %2146 = vmatprep.mubr.msk.f32.mxu1 %vm2562_vm1, %v2561_v1  ;;  %2156 = vmatpush3.msra.mxu0 %v2651_v4  ;;  %v2782_v47 = vld [vmem:[%s3347_s6] ss:$0 sm:$0xff] }
   0xb   :  { %2157 = vmatprep.mubr.msk.f32.mxu0 %vm2562_vm1, %v2561_v1  ;;  %2160 = vmatprep.subr.mxu0 %v2561_v1 }
   0xc   :  { %2131 = vmatpush3.msra.mxu1 %v2677_v10  ;;  %2372 = vset.pattern.permute.xlu1 %v2568_v46 }
   0xd   :  { %2132 = vmatprep.subr.mxu1 %v2561_v1  ;;  %2373 = vset.pattern.permute.xlu0 %v2568_v46  ;;  %v80_v59 = vld [vmem:[#allocation4] sm:$0x3] }
   0xe   :  { %2133 = vmatpush3.msra.mxu1 %v2682_v11  ;;  %v293_v60 = vsub.f32 1.0, %v80_v59 }
   0xf   :  { %2134 = vmatprep.subr.mxu1 %v2561_v1 }
  0x10   :  { %2135 = vmatpush3.msra.mxu1 %v2689_v12 }
  0x11   :  { %2136 = vmatprep.subr.mxu1 %v2561_v1 }
  0x12   :  { %2137 = vmatpush3.msra.mxu1 %v2696_v13 }
  0x13   :  { %2138 = vmatprep.subr.mxu1 %v2561_v1 }
  0x14   :  { %2139 = vmatpush3.msra.mxu1 %v2703_v14 }
  0x15   :  { %2140 = vmatprep.subr.mxu1 %v2561_v1 }
  0x16   :  { %2141 = vmatpush3.msra.mxu1 %v2710_v16 }
  0x17   :  { %2142 = vmatprep.subr.mxu1 %v2561_v1 }
  0x18   :  { %2143 = vmatpush3.msra.mxu1 %v2721_v21 }
  0x19   :  { %2144 = vmatprep.subr.mxu1 %v2561_v1 }
  0x1a   :  { %2145 = vmatpush3.msra.mxu1 %v2728_v22 }
  0x1b   :  { %2179 = vmatprep.subr.mxu1 %v2561_v1 }
  0xc9   :  { %v152_v7 = vpop.f32.mrf.mxu1 }
  0xca   :  { %v156_v8 = vadd.f32 %v152_v7, %v81_v6 }
  0xcb   :  { %v2129_v9 = vpop.f32.mrf.mxu1 }
  0xcc   :  { %2374 = vtanh.f32 %v156_v8  ;;  %v1961_v18 = vmul.f32 -1.442695, %v156_v8 }
  0xce   :  { %2376 = vpow2.f32 %v1961_v18 }
  0xd9   :  { %v2375_v15 = vpop.eup %2374 }
  0xda   :  { %170 = vrot.lane.b32.xlu0 %v2375_v15, %s2563_s27 }
  0xdb   :  { %v2377_v19 = vpop.eup %2376 }
  0xdc   :  { %v160_v20 = vadd.f32 1.0, %v2377_v19 }
  0xde   :  { %165 = vrot.lane.b32.xlu0 %v79_v17, %s2564_s28  ;;  %2378 = vrcp.f32 %v160_v20 }
  0xeb   :  { %v2732_v23 = vpop.eup %2378 }
 0x14c   :  { %v171_v24 = vpop.permute.xlu0 %170 }
 0x14d   :  { %v173_v25 = vmul.f32 %v2732_v23, %v171_v24 }
 0x14f   :  { %175 = vrot.lane.b32.xlu1 %v173_v25, %s2564_s28 }
 0x150   :  { %v2739_v27 = vpop.permute.xlu0 %165 }
 0x151   :  { %v168_v28 = vmul.f32 %v2732_v23, %v2739_v27 }
 0x153   :  { %275 = vrot.lane.b32.xlu1 %v1958_v26, %s2565_s13 }
 0x1c1   :  { %v176_v29 = vpop.permute.xlu1 %175 }
 0x1c2   :  { %v2743_v30 = vadd.f32 %v176_v29, %v168_v28 }
 0x1c4   :  { %v185_v31 = vsel %vm82_vm2, %v79_v17, %v2743_v30 }
 0x1c5   :  { %2147 = vmatmul.mubr.msk.f32.vlgmr.msra.gmra.mxu1 %vm186_vm3, %v185_v31  ;;  %v2764_v37 = vpop.permute.xlu1 %275 }
 0x1c6   :  { %2180 = vmatpush3.msra.mxu1 %v2622_v0  ;;  %2187 = vmatprep.mubr.msk.f32.mxu1 %vm2562_vm1, %v2561_v1 }
 0x1c7   :  { %2181 = vmatprep.subr.mxu1 %v2561_v1 }
 0x1c8   :  { %2182 = vmatpush3.msra.mxu1 %v2628_v2 }
 0x1c9   :  { %2183 = vmatprep.subr.mxu1 %v2561_v1 }
 0x1ca   :  { %2184 = vmatpush3.msra.mxu1 %v2642_v3 }
 0x1cb   :  { %2185 = vmatprep.subr.mxu1 %v2561_v1 }
 0x1cc   :  { %2186 = vmatpush3.msra.mxu1 %v2651_v4 }
 0x1cd   :  { %2190 = vmatprep.subr.mxu1 %v2561_v1 }
 0x285   :  { %v256_v33 = vpop.f32.mrf.mxu1 }
 0x286   :  { %v257_v34 = vadd.f32 %v2761_v32, %v256_v33 }
 0x287   :  { %v2148_v35 = vpop.f32.mrf.mxu1 }
 0x288   :  { %vm260_vm4 = vcmp.ge.f32.partialorder %v257_v34, 0.0  ;;  %v261_v36 = vmul.f32 0.01, %v257_v34 }
 0x28a   :  { %v262_v38 = vsel %vm260_vm4, %v257_v34, %v261_v36 }
 0x28b   :  { %v278_v39 = vmul.f32 %v2764_v37, %v262_v38  ;;  %v263_v41 = vmul.f32 %v2771_v40, %v262_v38 }
 0x28d   :  { %280 = vrot.lane.b32.xlu0 %v278_v39, %s2566_s15  ;;  %v265_v42 = vsel %vm264_vm5, %v263_v41, 0.0 }
 0x2ac   :  { %266 = vadd.xlane.f32.xlu0 %v265_v42 }
 0x2ff   :  { %v281_v44 = vpop.permute.xlu0 %280 }
 0x300   :  { %v283_v45 = vsel %vm264_vm5, %v281_v44, 0.0 }
 0x301   :  { %284 = vadd.xlane.f32.xlu1 %v283_v45 }
 0x335   :  { %v267_v54 = vpop.xlane.xlu0 %266 }
 0x336   :  { %v268_v55 = vadd.f32 %v2782_v47, %v267_v54 }
 0x338   :  { %v1963_v56 = vmul.f32 -1.442695, %v268_v55 }
 0x38a   :  { %v285_v48 = vpop.xlane.xlu1 %284 }
 0x38b   :  { %v286_v49 = vadd.f32 %v2782_v47, %v285_v48 }
 0x38d   :  { %v1964_v50 = vmul.f32 -1.442695, %v286_v49 }
 0x38f   :  { %2380 = vpow2.f32 %v1964_v50 }
 0x39c   :  { %v2381_v51 = vpop.eup %2380 }
 0x39d   :  { %v290_v52 = vadd.f32 1.0, %v2381_v51 }
 0x39f   :  { %2382 = vrcp.f32 %v290_v52 }
 0x3a0   :  { %2384 = vpow2.f32 %v1963_v56 }
 0x3ac   :  { %v2383_v53 = vpop.eup %2382 }
 0x3ad   :  { %297 = vrot.lane.b32.xlu0 %v2383_v53, %s2569_s20  ;;  %v2385_v57 = vpop.eup %2384 }
 0x3ae   :  { %v272_v58 = vadd.f32 1.0, %v2385_v57 }
 0x3b0   :  { %2386 = vrcp.f32 %v272_v58 }
 0x3b1   :  { %306 = vrot.lane.b32.xlu0 %v2659_v5, %s2570_s21  ;;  %2388 = vtanh.f32 %v2743_v30 }
 0x3bd   :  { %v2387_v61 = vpop.eup %2386 }
 0x3be   :  { %v294_v62 = vmin.f32 %v2387_v61, %v293_v60  ;;  %v2389_v8 = vpop.eup %2388 }
 0x3c0   :  { %v295_v63 = vadd.f32 %v294_v62, %v80_v59 }
 0x41f   :  { %v298_v6 = vpop.permute.xlu0 %297 }
 0x420   :  { %vm300_vm7 = vcmp.gt.f32.partialorder %v295_v63, %v298_v6 }
 0x421   :  { %v301_v7 = vsel %vm300_vm7, 1, %v2568_v46  ;;  %v2791_v5 = vsel %vm300_vm7, 0.0, %v295_v63 }
 0x422   :  { %303 = vperm.xlu1 %2372, %v301_v7  }
 0x423   :  { %v307_v17 = vpop.permute.xlu0 %306 }
 0x426   :  { %181 = vrot.lane.b32.xlu1 %v2389_v8, %s2563_s27 }
 0x49d   :  { %v304_v9 = vpop.permute.xlu1 %303 }
 0x49e   :  { %vm305_vm8 = vcmp.eq.s32.totalorder %v304_v9, 1 }
 0x49f   :  { %v2827_v29 = vsel %vm305_vm8, %v2743_v30, %v2739_v27 }
 0x4a1   :  { %v182_v15 = vpop.permute.xlu1 %181 }
 0x4a2   :  { %v184_v18 = vmul.f32 %v2732_v23, %v182_v15  ;;  %v1965_v23 = vld [vmem:[%s3341_s0 + $0x2] sm:$0x3]  ;;  %v524_v15 = vsub.f32 1.0, %v2791_v5 }
 0x4a4   :  { %v2796_v19 = vsel %vm305_vm8, %v184_v18, %v307_v17 }
 0x4a5   :  { %313 = vrot.lane.b32.xlu1 %v2796_v19, %s2564_s28 }
 0x517   :  { %v314_v20 = vpop.permute.xlu1 %313 }
 0x518   :  { %317 = vst.msk [vmem:[#allocation5] sm:$0x3] %vm34_vm0, %v314_v20  ;;  %2158 = vmatmul.mubr.msk.f32.vlgmr.msra.gmra.mxu0 %vm82_vm2, %v314_v20 }
 0x519   :  { %2161 = vmatpush3.msra.mxu0 %v2677_v10  ;;  %2176 = vmatprep.mubr.msk.f32.mxu0 %vm2562_vm1, %v2561_v1 }
 0x51a   :  { %2162 = vmatprep.subr.mxu0 %v2561_v1 }
 0x51b   :  { %2163 = vmatpush3.msra.mxu0 %v2682_v11 }
 0x51c   :  { %2164 = vmatprep.subr.mxu0 %v2561_v1 }
 0x51d   :  { %2165 = vmatpush3.msra.mxu0 %v2689_v12 }
 0x51e   :  { %2166 = vmatprep.subr.mxu0 %v2561_v1 }
 0x51f   :  { %2167 = vmatpush3.msra.mxu0 %v2696_v13 }
 0x520   :  { %2168 = vmatprep.subr.mxu0 %v2561_v1 }
 0x521   :  { %2169 = vmatpush3.msra.mxu0 %v2703_v14 }
 0x522   :  { %2170 = vmatprep.subr.mxu0 %v2561_v1 }
 0x523   :  { %2171 = vmatpush3.msra.mxu0 %v2710_v16 }
 0x524   :  { %2172 = vmatprep.subr.mxu0 %v2561_v1 }
 0x525   :  { %2173 = vmatpush3.msra.mxu0 %v2721_v21 }
 0x526   :  { %2174 = vmatprep.subr.mxu0 %v2561_v1 }
 0x527   :  { %2175 = vmatpush3.msra.mxu0 %v2728_v22 }
 0x528   :  { %2209 = vmatprep.subr.mxu0 %v2561_v1 }
 0x5d8   :  { %v388_v24 = vpop.f32.mrf.mxu0 }
 0x5d9   :  { %v392_v25 = vadd.f32 %v1965_v23, %v388_v24 }
 0x5da   :  { %v2159_v26 = vpop.f32.mrf.mxu0 }
 0x5db   :  { %2390 = vtanh.f32 %v392_v25  ;;  %v1967_v31 = vmul.f32 -1.442695, %v392_v25 }
 0x5dd   :  { %2392 = vpow2.f32 %v1967_v31 }
 0x5e8   :  { %v2391_v28 = vpop.eup %2390 }
 0x5e9   :  { %402 = vrot.lane.b32.xlu0 %v2391_v28, %s2563_s27 }
 0x5ea   :  { %v2393_v33 = vpop.eup %2392 }
 0x5eb   :  { %v396_v34 = vadd.f32 1.0, %v2393_v33 }
 0x5ed   :  { %418 = vrot.lane.b32.xlu0 %v2827_v29, %s2570_s21  ;;  %2394 = vrcp.f32 %v396_v34 }
 0x5fa   :  { %v2395_v35 = vpop.eup %2394 }
 0x5fb   :  { %v400_v39 = vmul.f32 %v2395_v35, %v2827_v29 }
 0x65b   :  { %v403_v36 = vpop.permute.xlu0 %402 }
 0x65c   :  { %v405_v38 = vmul.f32 %v2395_v35, %v403_v36 }
 0x65e   :  { %407 = vrot.lane.b32.xlu1 %v405_v38, %s2564_s28 }
 0x65f   :  { %v419_v27 = vpop.permute.xlu0 %418 }
 0x6d0   :  { %v408_v41 = vpop.permute.xlu1 %407 }
 0x6d1   :  { %v2833_v42 = vadd.f32 %v408_v41, %v400_v39 }
 0x6d3   :  { %v421_v30 = vsel %vm82_vm2, %v419_v27, %v2833_v42 }
 0x6d4   :  { %2177 = vmatmul.mubr.msk.f32.vlgmr.msra.gmra.mxu0 %vm186_vm3, %v421_v30 }
 0x6d5   :  { %2210 = vmatpush3.msra.mxu0 %v2622_v0  ;;  %2217 = vmatprep.mubr.msk.f32.mxu0 %vm2562_vm1, %v2561_v1 }
 0x6d6   :  { %2211 = vmatprep.subr.mxu0 %v2561_v1 }
 0x6d7   :  { %2212 = vmatpush3.msra.mxu0 %v2628_v2 }
 0x6d8   :  { %2213 = vmatprep.subr.mxu0 %v2561_v1 }
 0x6d9   :  { %2214 = vmatpush3.msra.mxu0 %v2642_v3 }
 0x6da   :  { %2215 = vmatprep.subr.mxu0 %v2561_v1 }
 0x6db   :  { %2216 = vmatpush3.msra.mxu0 %v2651_v4 }
 0x6dc   :  { %2220 = vmatprep.subr.mxu0 %v2561_v1 }
 0x794   :  { %v491_v43 = vpop.f32.mrf.mxu0 }
 0x795   :  { %v492_v44 = vadd.f32 %v2761_v32, %v491_v43 }
 0x796   :  { %v2178_v45 = vpop.f32.mrf.mxu0 }
 0x797   :  { %vm495_vm9 = vcmp.ge.f32.partialorder %v492_v44, 0.0  ;;  %v496_v48 = vmul.f32 0.01, %v492_v44 }
 0x799   :  { %v497_v49 = vsel %vm495_vm9, %v492_v44, %v496_v48 }
 0x79a   :  { %v509_v50 = vmul.f32 %v497_v49, %v2764_v37  ;;  %v498_v51 = vmul.f32 %v2771_v40, %v497_v49 }
 0x79c   :  { %511 = vrot.lane.b32.xlu1 %v509_v50, %s2566_s15  ;;  %v499_v52 = vsel %vm264_vm5, %v498_v51, 0.0 }
 0x7c0   :  { %500 = vadd.xlane.f32.xlu1 %v499_v52 }
 0x80e   :  { %v512_v53 = vpop.permute.xlu1 %511 }
 0x80f   :  { %v514_v54 = vsel %vm264_vm5, %v512_v53, 0.0 }
 0x810   :  { %515 = vadd.xlane.f32.xlu0 %v514_v54 }
 0x849   :  { %v501_v62 = vpop.xlane.xlu1 %500 }
 0x84a   :  { %v502_v63 = vadd.f32 %v2782_v47, %v501_v62 }
 0x84c   :  { %v1969_v6 = vmul.f32 -1.442695, %v502_v63 }
 0x899   :  { %v516_v55 = vpop.xlane.xlu0 %515 }
 0x89a   :  { %v517_v56 = vadd.f32 %v2782_v47, %v516_v55 }
 0x89c   :  { %v1970_v57 = vmul.f32 -1.442695, %v517_v56 }
 0x89e   :  { %2396 = vpow2.f32 %v1970_v57 }
 0x8ab   :  { %v2397_v58 = vpop.eup %2396 }
 0x8ac   :  { %v521_v59 = vadd.f32 1.0, %v2397_v58 }
 0x8ae   :  { %2398 = vrcp.f32 %v521_v59 }
 0x8af   :  { %2400 = vtanh.f32 %v2833_v42 }
 0x8b0   :  { %2402 = vpow2.f32 %v1969_v6 }
 0x8bb   :  { %v2399_v60 = vpop.eup %2398 }
 0x8bc   :  { %528 = vrot.lane.b32.xlu0 %v2399_v60, %s2569_s20  ;;  %v2401_v61 = vpop.eup %2400 }
 0x8bd   :  { %v2403_v7 = vpop.eup %2402 }
 0x8be   :  { %v506_v8 = vadd.f32 1.0, %v2403_v7 }
 0x8c0   :  { %413 = vrot.lane.b32.xlu0 %v2401_v61, %s2563_s27  ;;  %2404 = vrcp.f32 %v506_v8 }
 0x8cd   :  { %v2405_v9 = vpop.eup %2404 }
 0x8ce   :  { %v525_v17 = vmin.f32 %v2405_v9, %v524_v15 }
 0x8d0   :  { %v526_v18 = vadd.f32 %v525_v17, %v2791_v5  ;;  %v1971_v5 = vld [vmem:[%s3341_s0 + $0x4] sm:$0x3] }
 0x92e   :  { %v529_v20 = vpop.permute.xlu0 %528 }
 0x92f   :  { %vm531_vm10 = vcmp.gt.f32.partialorder %v526_v18, %v529_v20 }
 0x930   :  { %v532_v23 = vsel %vm531_vm10, 1, %v2568_v46  ;;  %v2862_v24 = vsel %vm531_vm10, 0.0, %v526_v18 }
 0x931   :  { %534 = vperm.xlu1 %2372, %v532_v23  }
 0x932   :  { %v414_v25 = vpop.permute.xlu0 %413 }
 0x933   :  { %v416_v26 = vmul.f32 %v2395_v35, %v414_v25  ;;  %v752_v25 = vsub.f32 1.0, %v2862_v24 }
 0x9ac   :  { %v535_v28 = vpop.permute.xlu1 %534 }
 0x9ad   :  { %vm536_vm11 = vcmp.eq.s32.totalorder %v535_v28, 1 }
 0x9ae   :  { %v2866_v31 = vsel %vm536_vm11, %v416_v26, %v2796_v19  ;;  %v2897_v38 = vsel %vm536_vm11, %v2833_v42, %v2827_v29 }
 0x9af   :  { %541 = vrot.lane.b32.xlu1 %v2866_v31, %s2564_s28 }
 0xa21   :  { %v542_v33 = vpop.permute.xlu1 %541 }
 0xa22   :  { %545 = vst.msk [vmem:[#allocation5 + $0x2] sm:$0x3] %vm34_vm0, %v542_v33  ;;  %2188 = vmatmul.mubr.msk.f32.vlgmr.msra.gmra.mxu1 %vm82_vm2, %v542_v33 }
 0xa23   :  { %2191 = vmatpush3.msra.mxu1 %v2677_v10  ;;  %2206 = vmatprep.mubr.msk.f32.mxu1 %vm2562_vm1, %v2561_v1 }
 0xa24   :  { %2192 = vmatprep.subr.mxu1 %v2561_v1 }
 0xa25   :  { %2193 = vmatpush3.msra.mxu1 %v2682_v11 }
 0xa26   :  { %2194 = vmatprep.subr.mxu1 %v2561_v1 }
 0xa27   :  { %2195 = vmatpush3.msra.mxu1 %v2689_v12 }
 0xa28   :  { %2196 = vmatprep.subr.mxu1 %v2561_v1 }
 0xa29   :  { %2197 = vmatpush3.msra.mxu1 %v2696_v13 }
 0xa2a   :  { %2198 = vmatprep.subr.mxu1 %v2561_v1 }
 0xa2b   :  { %2199 = vmatpush3.msra.mxu1 %v2703_v14 }
 0xa2c   :  { %2200 = vmatprep.subr.mxu1 %v2561_v1 }
 0xa2d   :  { %2201 = vmatpush3.msra.mxu1 %v2710_v16 }
 0xa2e   :  { %2202 = vmatprep.subr.mxu1 %v2561_v1 }
 0xa2f   :  { %2203 = vmatpush3.msra.mxu1 %v2721_v21 }
 0xa30   :  { %2204 = vmatprep.subr.mxu1 %v2561_v1 }
 0xa31   :  { %2205 = vmatpush3.msra.mxu1 %v2728_v22 }
 0xa32   :  { %2239 = vmatprep.subr.mxu1 %v2561_v1 }
 0xae2   :  { %v616_v19 = vpop.f32.mrf.mxu1 }
 0xae3   :  { %v620_v34 = vadd.f32 %v1971_v5, %v616_v19 }
 0xae4   :  { %v2189_v35 = vpop.f32.mrf.mxu1 }
 0xae5   :  { %2406 = vtanh.f32 %v620_v34  ;;  %v1973_v39 = vmul.f32 -1.442695, %v620_v34 }
 0xae7   :  { %2408 = vpow2.f32 %v1973_v39 }
 0xaf2   :  { %v2407_v36 = vpop.eup %2406 }
 0xaf3   :  { %630 = vrot.lane.b32.xlu0 %v2407_v36, %s2563_s27 }
 0xaf4   :  { %v2409_v41 = vpop.eup %2408 }
 0xaf5   :  { %v624_v27 = vadd.f32 1.0, %v2409_v41 }
 0xaf7   :  { %646 = vrot.lane.b32.xlu0 %v2897_v38, %s2570_s21  ;;  %2410 = vrcp.f32 %v624_v27 }
 0xb04   :  { %v2411_v30 = vpop.eup %2410 }
 0xb05   :  { %v628_v45 = vmul.f32 %v2411_v30, %v2897_v38 }
 0xb65   :  { %v631_v43 = vpop.permute.xlu0 %630 }
 0xb66   :  { %v633_v44 = vmul.f32 %v2411_v30, %v631_v43 }
 0xb68   :  { %635 = vrot.lane.b32.xlu1 %v633_v44, %s2564_s28 }
 0xb69   :  { %v647_v29 = vpop.permute.xlu0 %646 }
 0xbda   :  { %v636_v48 = vpop.permute.xlu1 %635 }
 0xbdb   :  { %v2903_v49 = vadd.f32 %v636_v48, %v628_v45 }
 0xbdd   :  { %v649_v42 = vsel %vm82_vm2, %v647_v29, %v2903_v49 }
 0xbde   :  { %2207 = vmatmul.mubr.msk.f32.vlgmr.msra.gmra.mxu1 %vm186_vm3, %v649_v42 }
 0xbdf   :  { %2240 = vmatpush3.msra.mxu1 %v2622_v0  ;;  %2247 = vmatprep.mubr.msk.f32.mxu1 %vm2562_vm1, %v2561_v1 }
 0xbe0   :  { %2241 = vmatprep.subr.mxu1 %v2561_v1 }
 0xbe1   :  { %2242 = vmatpush3.msra.mxu1 %v2628_v2 }
 0xbe2   :  { %2243 = vmatprep.subr.mxu1 %v2561_v1 }
 0xbe3   :  { %2244 = vmatpush3.msra.mxu1 %v2642_v3 }
 0xbe4   :  { %2245 = vmatprep.subr.mxu1 %v2561_v1 }
 0xbe5   :  { %2246 = vmatpush3.msra.mxu1 %v2651_v4 }
 0xbe6   :  { %2250 = vmatprep.subr.mxu1 %v2561_v1 }
 0xc9e   :  { %v719_v50 = vpop.f32.mrf.mxu1 }
 0xc9f   :  { %v720_v51 = vadd.f32 %v2761_v32, %v719_v50 }
 0xca0   :  { %v2208_v52 = vpop.f32.mrf.mxu1 }
 0xca1   :  { %vm723_vm12 = vcmp.ge.f32.partialorder %v720_v51, 0.0  ;;  %v724_v53 = vmul.f32 0.01, %v720_v51 }
 0xca3   :  { %v725_v54 = vsel %vm723_vm12, %v720_v51, %v724_v53 }
 0xca4   :  { %v737_v55 = vmul.f32 %v725_v54, %v2764_v37  ;;  %v726_v56 = vmul.f32 %v2771_v40, %v725_v54 }
 0xca6   :  { %739 = vrot.lane.b32.xlu1 %v737_v55, %s2566_s15  ;;  %v727_v57 = vsel %vm264_vm5, %v726_v56, 0.0 }
 0xcca   :  { %728 = vadd.xlane.f32.xlu1 %v727_v57 }
 0xd18   :  { %v740_v58 = vpop.permute.xlu1 %739 }
 0xd19   :  { %v742_v59 = vsel %vm264_vm5, %v740_v58, 0.0 }
 0xd1a   :  { %743 = vadd.xlane.f32.xlu0 %v742_v59 }
 0xd53   :  { %v729_v9 = vpop.xlane.xlu1 %728 }
 0xd54   :  { %v730_v15 = vadd.f32 %v2782_v47, %v729_v9 }
 0xd56   :  { %v1975_v17 = vmul.f32 -1.442695, %v730_v15 }
 0xda3   :  { %v744_v60 = vpop.xlane.xlu0 %743 }
 0xda4   :  { %v745_v61 = vadd.f32 %v2782_v47, %v744_v60 }
 0xda6   :  { %v1976_v62 = vmul.f32 -1.442695, %v745_v61 }
 0xda8   :  { %2412 = vpow2.f32 %v1976_v62 }
 0xdb5   :  { %v2413_v63 = vpop.eup %2412 }
 0xdb6   :  { %v749_v6 = vadd.f32 1.0, %v2413_v63 }
 0xdb8   :  { %2414 = vrcp.f32 %v749_v6 }
 0xdb9   :  { %2416 = vtanh.f32 %v2903_v49 }
 0xdba   :  { %2418 = vpow2.f32 %v1975_v17 }
 0xdc5   :  { %v2415_v7 = vpop.eup %2414 }
 0xdc6   :  { %756 = vrot.lane.b32.xlu0 %v2415_v7, %s2569_s20  ;;  %v2417_v8 = vpop.eup %2416 }
 0xdc7   :  { %v2419_v18 = vpop.eup %2418 }
 0xdc8   :  { %v734_v20 = vadd.f32 1.0, %v2419_v18 }
 0xdca   :  { %641 = vrot.lane.b32.xlu0 %v2417_v8, %s2563_s27  ;;  %2420 = vrcp.f32 %v734_v20 }
 0xdd7   :  { %v2421_v23 = vpop.eup %2420 }
 0xdd8   :  { %v753_v26 = vmin.f32 %v2421_v23, %v752_v25 }
 0xdda   :  { %v754_v28 = vadd.f32 %v753_v26, %v2862_v24  ;;  %v1977_v24 = vld [vmem:[%s3341_s0 + $0x6] sm:$0x3] }
 0xe38   :  { %v757_v33 = vpop.permute.xlu0 %756 }
 0xe39   :  { %vm759_vm13 = vcmp.gt.f32.partialorder %v754_v28, %v757_v33 }
 0xe3a   :  { %v760_v5 = vsel %vm759_vm13, 1, %v2568_v46  ;;  %v2932_v19 = vsel %vm759_vm13, 0.0, %v754_v28 }
 0xe3b   :  { %762 = vperm.xlu1 %2372, %v760_v5  }
 0xe3c   :  { %v642_v34 = vpop.permute.xlu0 %641 }
 0xe3d   :  { %v644_v35 = vmul.f32 %v2411_v30, %v642_v34  ;;  %v980_v34 = vsub.f32 1.0, %v2932_v19 }
 0xeb6   :  { %v763_v36 = vpop.permute.xlu1 %762 }
 0xeb7   :  { %vm764_vm14 = vcmp.eq.s32.totalorder %v763_v36, 1 }
 0xeb8   :  { %v2936_v39 = vsel %vm764_vm14, %v644_v35, %v2866_v31  ;;  %v2967_v44 = vsel %vm764_vm14, %v2903_v49, %v2897_v38 }
 0xeb9   :  { %769 = vrot.lane.b32.xlu1 %v2936_v39, %s2564_s28 }
 0xf2b   :  { %v770_v41 = vpop.permute.xlu1 %769 }
 0xf2c   :  { %773 = vst.msk [vmem:[#allocation5 + $0x4] sm:$0x3] %vm34_vm0, %v770_v41  ;;  %2218 = vmatmul.mubr.msk.f32.vlgmr.msra.gmra.mxu0 %vm82_vm2, %v770_v41 }
 0xf2d   :  { %2221 = vmatpush3.msra.mxu0 %v2677_v10  ;;  %2236 = vmatprep.mubr.msk.f32.mxu0 %vm2562_vm1, %v2561_v1 }
 0xf2e   :  { %2222 = vmatprep.subr.mxu0 %v2561_v1 }
 0xf2f   :  { %2223 = vmatpush3.msra.mxu0 %v2682_v11 }
 0xf30   :  { %2224 = vmatprep.subr.mxu0 %v2561_v1 }
 0xf31   :  { %2225 = vmatpush3.msra.mxu0 %v2689_v12 }
 0xf32   :  { %2226 = vmatprep.subr.mxu0 %v2561_v1 }
 0xf33   :  { %2227 = vmatpush3.msra.mxu0 %v2696_v13 }
 0xf34   :  { %2228 = vmatprep.subr.mxu0 %v2561_v1 }
 0xf35   :  { %2229 = vmatpush3.msra.mxu0 %v2703_v14 }
 0xf36   :  { %2230 = vmatprep.subr.mxu0 %v2561_v1 }
 0xf37   :  { %2231 = vmatpush3.msra.mxu0 %v2710_v16 }
 0xf38   :  { %2232 = vmatprep.subr.mxu0 %v2561_v1 }
 0xf39   :  { %2233 = vmatpush3.msra.mxu0 %v2721_v21 }
 0xf3a   :  { %2234 = vmatprep.subr.mxu0 %v2561_v1 }
 0xf3b   :  { %2235 = vmatpush3.msra.mxu0 %v2728_v22 }
 0xf3c   :  { %2269 = vmatprep.subr.mxu0 %v2561_v1 }
 0xfec   :  { %v844_v31 = vpop.f32.mrf.mxu0 }
 0xfed   :  { %v848_v27 = vadd.f32 %v1977_v24, %v844_v31 }
 0xfee   :  { %v2219_v30 = vpop.f32.mrf.mxu0 }
 0xfef   :  { %2422 = vtanh.f32 %v848_v27  ;;  %v1979_v45 = vmul.f32 -1.442695, %v848_v27 }
 0xff1   :  { %2424 = vpow2.f32 %v1979_v45 }
 0xffc   :  { %v2423_v43 = vpop.eup %2422 }
 0xffd   :  { %858 = vrot.lane.b32.xlu0 %v2423_v43, %s2563_s27 }
 0xffe   :  { %v2425_v48 = vpop.eup %2424 }
 0xfff   :  { %v852_v29 = vadd.f32 1.0, %v2425_v48 }
0x1001   :  { %874 = vrot.lane.b32.xlu0 %v2967_v44, %s2570_s21  ;;  %2426 = vrcp.f32 %v852_v29 }
0x100e   :  { %v2427_v42 = vpop.eup %2426 }
0x100f   :  { %v856_v52 = vmul.f32 %v2427_v42, %v2967_v44 }
0x106f   :  { %v859_v50 = vpop.permute.xlu0 %858 }
0x1070   :  { %v861_v51 = vmul.f32 %v2427_v42, %v859_v50 }
0x1072   :  { %863 = vrot.lane.b32.xlu1 %v861_v51, %s2564_s28 }
0x1073   :  { %v875_v38 = vpop.permute.xlu0 %874 }
0x10e4   :  { %v864_v53 = vpop.permute.xlu1 %863 }
0x10e5   :  { %v2973_v54 = vadd.f32 %v864_v53, %v856_v52 }
0x10e7   :  { %v877_v49 = vsel %vm82_vm2, %v875_v38, %v2973_v54 }
0x10e8   :  { %2237 = vmatmul.mubr.msk.f32.vlgmr.msra.gmra.mxu0 %vm186_vm3, %v877_v49 }
0x10e9   :  { %2270 = vmatpush3.msra.mxu0 %v2622_v0  ;;  %2277 = vmatprep.mubr.msk.f32.mxu0 %vm2562_vm1, %v2561_v1 }
0x10ea   :  { %2271 = vmatprep.subr.mxu0 %v2561_v1 }
0x10eb   :  { %2272 = vmatpush3.msra.mxu0 %v2628_v2 }
0x10ec   :  { %2273 = vmatprep.subr.mxu0 %v2561_v1 }
0x10ed   :  { %2274 = vmatpush3.msra.mxu0 %v2642_v3 }
0x10ee   :  { %2275 = vmatprep.subr.mxu0 %v2561_v1 }
0x10ef   :  { %2276 = vmatpush3.msra.mxu0 %v2651_v4 }
0x10f0   :  { %2280 = vmatprep.subr.mxu0 %v2561_v1 }
0x11a8   :  { %v947_v55 = vpop.f32.mrf.mxu0 }
0x11a9   :  { %v948_v56 = vadd.f32 %v2761_v32, %v947_v55 }
0x11aa   :  { %v2238_v57 = vpop.f32.mrf.mxu0 }
0x11ab   :  { %vm951_vm15 = vcmp.ge.f32.partialorder %v948_v56, 0.0  ;;  %v952_v58 = vmul.f32 0.01, %v948_v56 }
0x11ad   :  { %v953_v59 = vsel %vm951_vm15, %v948_v56, %v952_v58 }
0x11ae   :  { %v965_v60 = vmul.f32 %v953_v59, %v2764_v37  ;;  %v954_v61 = vmul.f32 %v2771_v40, %v953_v59 }
0x11b0   :  { %967 = vrot.lane.b32.xlu1 %v965_v60, %s2566_s15  ;;  %v955_v62 = vsel %vm264_vm5, %v954_v61, 0.0 }
0x11d4   :  { %956 = vadd.xlane.f32.xlu1 %v955_v62 }
0x1222   :  { %v968_v63 = vpop.permute.xlu1 %967 }
0x1223   :  { %v970_v6 = vsel %vm264_vm5, %v968_v63, 0.0 }
0x1224   :  { %971 = vadd.xlane.f32.xlu0 %v970_v6 }
0x125d   :  { %v957_v23 = vpop.xlane.xlu1 %956 }
0x125e   :  { %v958_v25 = vadd.f32 %v2782_v47, %v957_v23 }
0x1260   :  { %v1981_v26 = vmul.f32 -1.442695, %v958_v25 }
0x12ad   :  { %v972_v7 = vpop.xlane.xlu0 %971 }
0x12ae   :  { %v973_v8 = vadd.f32 %v2782_v47, %v972_v7 }
0x12b0   :  { %v1982_v9 = vmul.f32 -1.442695, %v973_v8 }
0x12b2   :  { %2428 = vpow2.f32 %v1982_v9 }
0x12bf   :  { %v2429_v15 = vpop.eup %2428 }
0x12c0   :  { %v977_v17 = vadd.f32 1.0, %v2429_v15 }
0x12c2   :  { %2430 = vrcp.f32 %v977_v17 }
0x12c3   :  { %2432 = vtanh.f32 %v2973_v54 }
0x12c4   :  { %2434 = vpow2.f32 %v1981_v26 }
0x12cf   :  { %v2431_v18 = vpop.eup %2430 }
0x12d0   :  { %984 = vrot.lane.b32.xlu0 %v2431_v18, %s2569_s20  ;;  %v2433_v20 = vpop.eup %2432 }
0x12d1   :  { %v2435_v28 = vpop.eup %2434 }
0x12d2   :  { %v962_v33 = vadd.f32 1.0, %v2435_v28 }
0x12d4   :  { %869 = vrot.lane.b32.xlu0 %v2433_v20, %s2563_s27  ;;  %2436 = vrcp.f32 %v962_v33 }
0x12e1   :  { %v2437_v5 = vpop.eup %2436 }
0x12e2   :  { %v981_v35 = vmin.f32 %v2437_v5, %v980_v34 }
0x12e4   :  { %v982_v36 = vadd.f32 %v981_v35, %v2932_v19  ;;  %v3085_v35 = vld [vmem:[%s3343_s2 + $0x38] sm:$0xff] }
0x1342   :  { %v985_v41 = vpop.permute.xlu0 %984 }
0x1343   :  { %vm987_vm4 = vcmp.gt.f32.partialorder %v982_v36, %v985_v41  ;;  %v3101_v41 = vld [vmem:[%s3343_s2 + $0x28] sm:$0xff] }
0x1344   :  { %v988_v24 = vsel %vm987_vm4, 1, %v2568_v46  ;;  %v3002_v31 = vsel %vm987_vm4, 0.0, %v982_v36  ;;  %v3094_v36 = vld [vmem:[%s3343_s2 + $0x30] sm:$0xff] }
0x1345   :  { %990 = vperm.xlu1 %2372, %v988_v24   ;;  %v1208_v17 = vsub.f32 1.0, %v3002_v31  ;;  %v3108_v24 = vld [vmem:[%s3343_s2 + $0x20] sm:$0xff] }
0x1346   :  { %v870_v27 = vpop.permute.xlu0 %869 }
0x1347   :  { %v872_v30 = vmul.f32 %v2427_v42, %v870_v27  ;;  %v3122_v27 = vld [vmem:[%s3343_s2 + $0x10] sm:$0xff] }
0x13c0   :  { %v991_v43 = vpop.permute.xlu1 %990 }
0x13c1   :  { %vm992_vm7 = vcmp.eq.s32.totalorder %v991_v43, 1  ;;  %v3136_v43 = vld [vmem:[%s3343_s2] sm:$0xff] }
0x13c2   :  { %v3006_v45 = vsel %vm992_vm7, %v872_v30, %v2936_v39  ;;  %v3129_v30 = vld [vmem:[%s3343_s2 + $0x8] sm:$0xff] }
0x13c3   :  { %997 = vrot.lane.b32.xlu1 %v3006_v45, %s2564_s28 }
0x1435   :  { %v998_v48 = vpop.permute.xlu1 %997 }
0x1436   :  { %1001 = vst.msk [vmem:[#allocation5 + $0x6] sm:$0x3] %vm34_vm0, %v998_v48  ;;  %2248 = vmatmul.mubr.msk.f32.vlgmr.msra.gmra.mxu1 %vm82_vm2, %v998_v48 }
0x1437   :  { %2251 = vmatpush3.msra.mxu1 %v2677_v10  ;;  %2266 = vmatprep.mubr.msk.f32.mxu1 %vm2562_vm1, %v2561_v1  ;;  %v1983_v10 = vld [vmem:[%s3341_s0 + $0x8] sm:$0x3] }
0x1438   :  { %2252 = vmatprep.subr.mxu1 %v2561_v1 }
0x1439   :  { %2253 = vmatpush3.msra.mxu1 %v2682_v11 }
0x143a   :  { %2254 = vmatprep.subr.mxu1 %v2561_v1 }
0x143b   :  { %2255 = vmatpush3.msra.mxu1 %v2689_v12 }
0x143c   :  { %2256 = vmatprep.subr.mxu1 %v2561_v1 }
0x143d   :  { %2257 = vmatpush3.msra.mxu1 %v2696_v13 }
0x143e   :  { %2258 = vmatprep.subr.mxu1 %v2561_v1 }
0x143f   :  { %2259 = vmatpush3.msra.mxu1 %v2703_v14 }
0x1440   :  { %2260 = vmatprep.subr.mxu1 %v2561_v1 }
0x1441   :  { %2261 = vmatpush3.msra.mxu1 %v2710_v16  ;;  %v3037_v16 = vsel %vm992_vm7, %v2973_v54, %v2967_v44 }
0x1442   :  { %2262 = vmatprep.subr.mxu1 %v2561_v1 }
0x1443   :  { %2263 = vmatpush3.msra.mxu1 %v2721_v21 }
0x1444   :  { %2264 = vmatprep.subr.mxu1 %v2561_v1 }
0x1445   :  { %2265 = vmatpush3.msra.mxu1 %v2728_v22 }
0x1446   :  { %2299 = vmatprep.subr.mxu1 %v2561_v1 }
0x14f6   :  { %v1072_v11 = vpop.f32.mrf.mxu1 }
0x14f7   :  { %v1076_v12 = vadd.f32 %v1983_v10, %v1072_v11 }
0x14f8   :  { %v2249_v13 = vpop.f32.mrf.mxu1 }
0x14f9   :  { %2438 = vtanh.f32 %v1076_v12  ;;  %v1985_v21 = vmul.f32 -1.442695, %v1076_v12 }
0x14fb   :  { %2440 = vpow2.f32 %v1985_v21 }
0x1506   :  { %v2439_v14 = vpop.eup %2438 }
0x1507   :  { %1086 = vrot.lane.b32.xlu0 %v2439_v14, %s2563_s27 }
0x1508   :  { %v2441_v22 = vpop.eup %2440 }
0x1509   :  { %v1080_v19 = vadd.f32 1.0, %v2441_v22 }
0x150b   :  { %1102 = vrot.lane.b32.xlu0 %v3037_v16, %s2570_s21  ;;  %2442 = vrcp.f32 %v1080_v19 }
0x1518   :  { %v2443_v39 = vpop.eup %2442 }
0x1519   :  { %v1084_v50 = vmul.f32 %v2443_v39, %v3037_v16 }
0x1579   :  { %v1087_v29 = vpop.permute.xlu0 %1086 }
0x157a   :  { %v1089_v42 = vmul.f32 %v2443_v39, %v1087_v29 }
0x157c   :  { %1091 = vrot.lane.b32.xlu1 %v1089_v42, %s2564_s28 }
0x157d   :  { %v1103_v44 = vpop.permute.xlu0 %1102 }
0x15ee   :  { %v1092_v51 = vpop.permute.xlu1 %1091 }
0x15ef   :  { %v3043_v52 = vadd.f32 %v1092_v51, %v1084_v50 }
0x15f1   :  { %v1105_v53 = vsel %vm82_vm2, %v1103_v44, %v3043_v52  ;;  %v2510_v44 = vld [vmem:[%s3342_s1 + $0x18] sm:$0xff] }
0x15f2   :  { %2267 = vmatmul.mubr.msk.f32.vlgmr.msra.gmra.mxu1 %vm186_vm3, %v1105_v53  ;;  %v2511_v53 = vld [vmem:[%s3342_s1 + $0x10] sm:$0xff] }
0x15f3   :  { %2300 = vmatpush3.msra.mxu1 %v2622_v0  ;;  %2307 = vmatprep.mubr.msk.f32.mxu1 %vm2562_vm1, %v2561_v1 }
0x15f4   :  { %2301 = vmatprep.subr.mxu1 %v2561_v1 }
0x15f5   :  { %2302 = vmatpush3.msra.mxu1 %v2628_v2 }
0x15f6   :  { %2303 = vmatprep.subr.mxu1 %v2561_v1 }
0x15f7   :  { %2304 = vmatpush3.msra.mxu1 %v2642_v3 }
0x15f8   :  { %2305 = vmatprep.subr.mxu1 %v2561_v1 }
0x15f9   :  { %2306 = vmatpush3.msra.mxu1 %v2651_v4 }
0x15fa   :  { %2310 = vmatprep.subr.mxu1 %v2561_v1 }
0x16b2   :  { %v1175_v54 = vpop.f32.mrf.mxu1 }
0x16b3   :  { %v1176_v0 = vadd.f32 %v2761_v32, %v1175_v54  ;;  %v2512_v54 = vld [vmem:[%s3342_s1 + $0x8] sm:$0xff] }
0x16b4   :  { %v2268_v38 = vpop.f32.mrf.mxu1 }
0x16b5   :  { %vm1179_vm8 = vcmp.ge.f32.partialorder %v1176_v0, 0.0  ;;  %v1180_v49 = vmul.f32 0.01, %v1176_v0 }
0x16b7   :  { %v1181_v55 = vsel %vm1179_vm8, %v1176_v0, %v1180_v49  ;;  %v2513_v0 = vld [vmem:[%s3342_s1] sm:$0xff] }
0x16b8   :  { %v1193_v56 = vmul.f32 %v1181_v55, %v2764_v37  ;;  %v1182_v2 = vmul.f32 %v2771_v40, %v1181_v55  ;;  %v3183_v49 = vld [vmem:[%s3344_s3] ss:$0 sm:$0xff] }
0x16ba   :  { %1195 = vrot.lane.b32.xlu1 %v1193_v56, %s2566_s15  ;;  %v1183_v3 = vsel %vm264_vm5, %v1182_v2, 0.0 }
0x16de   :  { %1184 = vadd.xlane.f32.xlu1 %v1183_v3 }
0x172c   :  { %v1196_v57 = vpop.permute.xlu1 %1195 }
0x172d   :  { %v1198_v4 = vsel %vm264_vm5, %v1196_v57, 0.0 }
0x172e   :  { %1199 = vadd.xlane.f32.xlu0 %v1198_v4  ;;  %v3191_v4 = vld [vmem:[%s3345_s4] ss:$0 sm:$0xff] }
0x1767   :  { %v1185_v63 = vpop.xlane.xlu1 %1184 }
0x1768   :  { %v1186_v6 = vadd.f32 %v2782_v47, %v1185_v63 }
0x176a   :  { %v1987_v7 = vmul.f32 -1.442695, %v1186_v6 }
0x17b7   :  { %v1200_v58 = vpop.xlane.xlu0 %1199 }
0x17b8   :  { %v1201_v32 = vadd.f32 %v2782_v47, %v1200_v58 }
0x17ba   :  { %v1988_v59 = vmul.f32 -1.442695, %v1201_v32 }
0x17bc   :  { %2444 = vpow2.f32 %v1988_v59 }
0x17c9   :  { %v2445_v60 = vpop.eup %2444 }
0x17ca   :  { %v1205_v61 = vadd.f32 1.0, %v2445_v60 }
0x17cc   :  { %2446 = vrcp.f32 %v1205_v61 }
0x17cd   :  { %2448 = vtanh.f32 %v3043_v52 }
0x17ce   :  { %2450 = vpow2.f32 %v1987_v7 }
0x17d9   :  { %v2447_v62 = vpop.eup %2446 }
0x17da   :  { %1212 = vrot.lane.b32.xlu0 %v2447_v62, %s2569_s20  ;;  %v2449_v40 = vpop.eup %2448  ;;  %v3199_v62 = vld [vmem:[%s3347_s6] ss:$0 sm:$0xff] }
0x17db   :  { %v2451_v8 = vpop.eup %2450 }
0x17dc   :  { %v1190_v9 = vadd.f32 1.0, %v2451_v8 }
0x17de   :  { %1097 = vrot.lane.b32.xlu0 %v2449_v40, %s2563_s27  ;;  %2452 = vrcp.f32 %v1190_v9 }
0x17eb   :  { %v2453_v15 = vpop.eup %2452 }
0x17ec   :  { %v1209_v18 = vmin.f32 %v2453_v15, %v1208_v17 }
0x17ee   :  { %v1210_v20 = vadd.f32 %v1209_v18, %v3002_v31  ;;  %v3115_v31 = vld [vmem:[%s3343_s2 + $0x18] sm:$0xff] }
0x184c   :  { %v1213_v23 = vpop.permute.xlu0 %1212 }
0x184d   :  { %vm1215_vm9 = vcmp.gt.f32.partialorder %v1210_v20, %v1213_v23 }
0x184e   :  { %v1216_v25 = vsel %vm1215_vm9, 1, %v2568_v46  ;;  %v3072_v26 = vsel %vm1215_vm9, 0.0, %v1210_v20 }
0x184f   :  { %1218 = vperm.xlu1 %2372, %v1216_v25  }
0x1850   :  { %v1098_v28 = vpop.permute.xlu0 %1097 }
0x1851   :  { %v1100_v47 = vmul.f32 %v2443_v39, %v1098_v28  ;;  %v1436_v28 = vsub.f32 1.0, %v3072_v26 }
0x18ca   :  { %v1219_v33 = vpop.permute.xlu1 %1218 }
0x18cb   :  { %vm1220_vm10 = vcmp.eq.s32.totalorder %v1219_v33, 1 }
0x18cc   :  { %v3076_v5 = vsel %vm1220_vm10, %v1100_v47, %v3006_v45  ;;  %v1989_v45 = vld [vmem:[%s3341_s0 + $0xa] sm:$0x3]  ;;  %v3147_v13 = vsel %vm1220_vm10, %v3043_v52, %v3037_v16 }
0x18cd   :  { %1225 = vrot.lane.b32.xlu1 %v3076_v5, %s2564_s28 }
0x193f   :  { %v1226_v34 = vpop.permute.xlu1 %1225 }
0x1940   :  { %1229 = vst.msk [vmem:[#allocation5 + $0x8] sm:$0x3] %vm34_vm0, %v1226_v34  ;;  %2278 = vmatmul.mubr.msk.f32.vlgmr.msra.gmra.mxu0 %vm82_vm2, %v1226_v34 }
0x1941   :  { %2281 = vmatpush3.msra.mxu0 %v3085_v35  ;;  %2296 = vmatprep.mubr.msk.f32.mxu0 %vm2562_vm1, %v2561_v1 }
0x1942   :  { %2282 = vmatprep.subr.mxu0 %v2561_v1 }
0x1943   :  { %2283 = vmatpush3.msra.mxu0 %v3094_v36 }
0x1944   :  { %2284 = vmatprep.subr.mxu0 %v2561_v1 }
0x1945   :  { %2285 = vmatpush3.msra.mxu0 %v3101_v41 }
0x1946   :  { %2286 = vmatprep.subr.mxu0 %v2561_v1 }
0x1947   :  { %2287 = vmatpush3.msra.mxu0 %v3108_v24 }
0x1948   :  { %2288 = vmatprep.subr.mxu0 %v2561_v1 }
0x1949   :  { %2289 = vmatpush3.msra.mxu0 %v3115_v31 }
0x194a   :  { %2290 = vmatprep.subr.mxu0 %v2561_v1 }
0x194b   :  { %2291 = vmatpush3.msra.mxu0 %v3122_v27 }
0x194c   :  { %2292 = vmatprep.subr.mxu0 %v2561_v1 }
0x194d   :  { %2293 = vmatpush3.msra.mxu0 %v3129_v30 }
0x194e   :  { %2294 = vmatprep.subr.mxu0 %v2561_v1 }
0x194f   :  { %2295 = vmatpush3.msra.mxu0 %v3136_v43 }
0x1950   :  { %2329 = vmatprep.subr.mxu0 %v2561_v1 }
0x1a00   :  { %v1300_v48 = vpop.f32.mrf.mxu0 }
0x1a01   :  { %v1304_v10 = vadd.f32 %v1989_v45, %v1300_v48 }
0x1a02   :  { %v2279_v11 = vpop.f32.mrf.mxu0 }
0x1a03   :  { %2454 = vtanh.f32 %v1304_v10  ;;  %v1991_v14 = vmul.f32 -1.442695, %v1304_v10 }
0x1a05   :  { %2456 = vpow2.f32 %v1991_v14 }
0x1a10   :  { %v2455_v12 = vpop.eup %2454 }
0x1a11   :  { %1314 = vrot.lane.b32.xlu0 %v2455_v12, %s2563_s27 }
0x1a12   :  { %v2457_v21 = vpop.eup %2456 }
0x1a13   :  { %v1308_v22 = vadd.f32 1.0, %v2457_v21 }
0x1a15   :  { %1330 = vrot.lane.b32.xlu0 %v3147_v13, %s2570_s21  ;;  %2458 = vrcp.f32 %v1308_v22 }
0x1a22   :  { %v3151_v19 = vpop.eup %2458 }
0x1a23   :  { %v1312_v42 = vmul.f32 %v3151_v19, %v3147_v13 }
0x1a83   :  { %v1315_v39 = vpop.permute.xlu0 %1314 }
0x1a84   :  { %v1317_v29 = vmul.f32 %v3151_v19, %v1315_v39 }
0x1a86   :  { %1319 = vrot.lane.b32.xlu1 %v1317_v29, %s2564_s28 }
0x1a87   :  { %v1331_v51 = vpop.permute.xlu0 %1330 }
0x1af8   :  { %v1320_v16 = vpop.permute.xlu1 %1319 }
0x1af9   :  { %v3157_v50 = vadd.f32 %v1320_v16, %v1312_v42 }
0x1afb   :  { %v1333_v52 = vsel %vm82_vm2, %v1331_v51, %v3157_v50 }
0x1afc   :  { %2297 = vmatmul.mubr.msk.f32.vlgmr.msra.gmra.mxu0 %vm186_vm3, %v1333_v52 }
0x1afd   :  { %2330 = vmatpush3.msra.mxu0 %v2510_v44  ;;  %2337 = vmatprep.mubr.msk.f32.mxu0 %vm2562_vm1, %v2561_v1 }
0x1afe   :  { %2331 = vmatprep.subr.mxu0 %v2561_v1 }
0x1aff   :  { %2332 = vmatpush3.msra.mxu0 %v2511_v53 }
0x1b00   :  { %2333 = vmatprep.subr.mxu0 %v2561_v1 }
0x1b01   :  { %2334 = vmatpush3.msra.mxu0 %v2512_v54 }
0x1b02   :  { %2335 = vmatprep.subr.mxu0 %v2561_v1 }
0x1b03   :  { %2336 = vmatpush3.msra.mxu0 %v2513_v0 }
0x1b04   :  { %2340 = vmatprep.subr.mxu0 %v2561_v1 }
0x1bbc   :  { %v1403_v38 = vpop.f32.mrf.mxu0 }
0x1bbd   :  { %v1404_v55 = vadd.f32 %v3183_v49, %v1403_v38 }
0x1bbe   :  { %v2298_v56 = vpop.f32.mrf.mxu0 }
0x1bbf   :  { %vm1407_vm11 = vcmp.ge.f32.partialorder %v1404_v55, 0.0  ;;  %v1408_v2 = vmul.f32 0.01, %v1404_v55 }
0x1bc1   :  { %v1409_v3 = vsel %vm1407_vm11, %v1404_v55, %v1408_v2 }
0x1bc2   :  { %v1421_v57 = vmul.f32 %v1409_v3, %v2764_v37  ;;  %v1410_v58 = vmul.f32 %v3191_v4, %v1409_v3 }
0x1bc4   :  { %1423 = vrot.lane.b32.xlu1 %v1421_v57, %s2566_s15  ;;  %v1411_v32 = vsel %vm264_vm5, %v1410_v58, 0.0 }
0x1be8   :  { %1412 = vadd.xlane.f32.xlu1 %v1411_v32 }
0x1c36   :  { %v1424_v59 = vpop.permute.xlu1 %1423 }
0x1c37   :  { %v1426_v60 = vsel %vm264_vm5, %v1424_v59, 0.0 }
0x1c38   :  { %1427 = vadd.xlane.f32.xlu0 %v1426_v60 }
0x1c71   :  { %v1413_v15 = vpop.xlane.xlu1 %1412 }
0x1c72   :  { %v1414_v17 = vadd.f32 %v3199_v62, %v1413_v15 }
0x1c74   :  { %v1993_v18 = vmul.f32 -1.442695, %v1414_v17 }
0x1cc1   :  { %v1428_v61 = vpop.xlane.xlu0 %1427 }
0x1cc2   :  { %v1429_v40 = vadd.f32 %v3199_v62, %v1428_v61 }
0x1cc4   :  { %v1994_v63 = vmul.f32 -1.442695, %v1429_v40 }
0x1cc6   :  { %2460 = vpow2.f32 %v1994_v63 }
0x1cd3   :  { %v2461_v6 = vpop.eup %2460 }
0x1cd4   :  { %v1433_v7 = vadd.f32 1.0, %v2461_v6 }
0x1cd6   :  { %2462 = vrcp.f32 %v1433_v7 }
0x1cd7   :  { %2464 = vtanh.f32 %v3157_v50 }
0x1cd8   :  { %2466 = vpow2.f32 %v1993_v18 }
0x1ce3   :  { %v2463_v8 = vpop.eup %2462 }
0x1ce4   :  { %1440 = vrot.lane.b32.xlu0 %v2463_v8, %s2569_s20  ;;  %v2465_v9 = vpop.eup %2464 }
0x1ce5   :  { %v2467_v20 = vpop.eup %2466 }
0x1ce6   :  { %v1418_v23 = vadd.f32 1.0, %v2467_v20 }
0x1ce8   :  { %1325 = vrot.lane.b32.xlu0 %v2465_v9, %s2563_s27  ;;  %2468 = vrcp.f32 %v1418_v23 }
0x1cf5   :  { %v2469_v25 = vpop.eup %2468 }
0x1cf6   :  { %v1437_v47 = vmin.f32 %v2469_v25, %v1436_v28 }
0x1cf8   :  { %v1438_v33 = vadd.f32 %v1437_v47, %v3072_v26 }
0x1d56   :  { %v1441_v34 = vpop.permute.xlu0 %1440 }
0x1d57   :  { %vm1443_vm12 = vcmp.gt.f32.partialorder %v1438_v33, %v1441_v34 }
0x1d58   :  { %v1444_v45 = vsel %vm1443_vm12, 1, %v2568_v46  ;;  %v3209_v48 = vsel %vm1443_vm12, 0.0, %v1438_v33 }
0x1d59   :  { %1446 = vperm.xlu1 %2372, %v1444_v45   ;;  %v1664_v47 = vsub.f32 1.0, %v3209_v48 }
0x1d5a   :  { %v1326_v10 = vpop.permute.xlu0 %1325 }
0x1d5b   :  { %v1328_v11 = vmul.f32 %v3151_v19, %v1326_v10 }
0x1dd4   :  { %v1447_v12 = vpop.permute.xlu1 %1446 }
0x1dd5   :  { %vm1448_vm13 = vcmp.eq.s32.totalorder %v1447_v12, 1 }
0x1dd6   :  { %v3214_v14 = vsel %vm1448_vm13, %v1328_v11, %v3076_v5  ;;  %v1995_v5 = vld [vmem:[%s3341_s0 + $0xc] sm:$0x3]  ;;  %v3244_v29 = vsel %vm1448_vm13, %v3157_v50, %v3147_v13 }
0x1dd7   :  { %1453 = vrot.lane.b32.xlu1 %v3214_v14, %s2564_s28 }
0x1e49   :  { %v1454_v26 = vpop.permute.xlu1 %1453 }
0x1e4a   :  { %1457 = vst.msk [vmem:[#allocation5 + $0xa] sm:$0x3] %vm34_vm0, %v1454_v26  ;;  %2308 = vmatmul.mubr.msk.f32.vlgmr.msra.gmra.mxu1 %vm82_vm2, %v1454_v26 }
0x1e4b   :  { %2311 = vmatpush3.msra.mxu1 %v3085_v35  ;;  %2326 = vmatprep.mubr.msk.f32.mxu1 %vm2562_vm1, %v2561_v1 }
0x1e4c   :  { %2312 = vmatprep.subr.mxu1 %v2561_v1 }
0x1e4d   :  { %2313 = vmatpush3.msra.mxu1 %v3094_v36 }
0x1e4e   :  { %2314 = vmatprep.subr.mxu1 %v2561_v1 }
0x1e4f   :  { %2315 = vmatpush3.msra.mxu1 %v3101_v41 }
0x1e50   :  { %2316 = vmatprep.subr.mxu1 %v2561_v1 }
0x1e51   :  { %2317 = vmatpush3.msra.mxu1 %v3108_v24 }
0x1e52   :  { %2318 = vmatprep.subr.mxu1 %v2561_v1 }
0x1e53   :  { %2319 = vmatpush3.msra.mxu1 %v3115_v31 }
0x1e54   :  { %2320 = vmatprep.subr.mxu1 %v2561_v1 }
0x1e55   :  { %2321 = vmatpush3.msra.mxu1 %v3122_v27 }
0x1e56   :  { %2322 = vmatprep.subr.mxu1 %v2561_v1 }
0x1e57   :  { %2323 = vmatpush3.msra.mxu1 %v3129_v30 }
0x1e58   :  { %2324 = vmatprep.subr.mxu1 %v2561_v1 }
0x1e59   :  { %2325 = vmatpush3.msra.mxu1 %v3136_v43 }
0x1f0a   :  { %v1528_v21 = vpop.f32.mrf.mxu1 }
0x1f0b   :  { %v1532_v22 = vadd.f32 %v1995_v5, %v1528_v21 }
0x1f0c   :  { %v2309_v19 = vpop.f32.mrf.mxu1 }
0x1f0d   :  { %2470 = vtanh.f32 %v1532_v22  ;;  %v1997_v42 = vmul.f32 -1.442695, %v1532_v22 }
0x1f0f   :  { %2472 = vpow2.f32 %v1997_v42 }
0x1f1a   :  { %v2471_v39 = vpop.eup %2470 }
0x1f1b   :  { %1542 = vrot.lane.b32.xlu0 %v2471_v39, %s2563_s27 }
0x1f1c   :  { %v2473_v16 = vpop.eup %2472 }
0x1f1d   :  { %v1536_v51 = vadd.f32 1.0, %v2473_v16 }
0x1f1f   :  { %1558 = vrot.lane.b32.xlu0 %v3244_v29, %s2570_s21  ;;  %2474 = vrcp.f32 %v1536_v51 }
0x1f2c   :  { %v2475_v52 = vpop.eup %2474 }
0x1f2d   :  { %v1540_v54 = vmul.f32 %v2475_v52, %v3244_v29 }
0x1f8d   :  { %v1543_v44 = vpop.permute.xlu0 %1542 }
0x1f8e   :  { %v1545_v53 = vmul.f32 %v2475_v52, %v1543_v44 }
0x1f90   :  { %1547 = vrot.lane.b32.xlu1 %v1545_v53, %s2564_s28 }
0x1f91   :  { %v1559_v13 = vpop.permute.xlu0 %1558 }
0x2002   :  { %v1548_v0 = vpop.permute.xlu1 %1547 }
0x2003   :  { %v3250_v38 = vadd.f32 %v1548_v0, %v1540_v54 }
0x2005   :  { %v1561_v50 = vsel %vm82_vm2, %v1559_v13, %v3250_v38 }
0x2006   :  { %2327 = vmatmul.mubr.msk.f32.vlgmr.msra.gmra.mxu1 %vm186_vm3, %v1561_v50 }
0x20c6   :  { %v1631_v55 = vpop.f32.mrf.mxu1 }
0x20c7   :  { %v1632_v56 = vadd.f32 %v3183_v49, %v1631_v55 }
0x20c8   :  { %v2328_v2 = vpop.f32.mrf.mxu1 }
0x20c9   :  { %vm1635_vm14 = vcmp.ge.f32.partialorder %v1632_v56, 0.0  ;;  %v1636_v3 = vmul.f32 0.01, %v1632_v56 }
0x20cb   :  { %v1637_v57 = vsel %vm1635_vm14, %v1632_v56, %v1636_v3 }
0x20cc   :  { %v1649_v58 = vmul.f32 %v1637_v57, %v2764_v37  ;;  %v1638_v32 = vmul.f32 %v3191_v4, %v1637_v57 }
0x20ce   :  { %1651 = vrot.lane.b32.xlu1 %v1649_v58, %s2566_s15  ;;  %v1639_v59 = vsel %vm264_vm5, %v1638_v32, 0.0 }
0x20f2   :  { %1640 = vadd.xlane.f32.xlu1 %v1639_v59 }
0x2140   :  { %v1652_v60 = vpop.permute.xlu1 %1651 }
0x2141   :  { %v1654_v61 = vsel %vm264_vm5, %v1652_v60, 0.0 }
0x2142   :  { %1655 = vadd.xlane.f32.xlu0 %v1654_v61 }
0x217b   :  { %v1641_v17 = vpop.xlane.xlu1 %1640 }
0x217c   :  { %v1642_v18 = vadd.f32 %v3199_v62, %v1641_v17 }
0x217e   :  { %v1999_v20 = vmul.f32 -1.442695, %v1642_v18 }
0x21cb   :  { %v1656_v40 = vpop.xlane.xlu0 %1655 }
0x21cc   :  { %v1657_v63 = vadd.f32 %v3199_v62, %v1656_v40 }
0x21ce   :  { %v2000_v6 = vmul.f32 -1.442695, %v1657_v63 }
0x21d0   :  { %2476 = vpow2.f32 %v2000_v6 }
0x21dd   :  { %v2477_v7 = vpop.eup %2476 }
0x21de   :  { %v1661_v8 = vadd.f32 1.0, %v2477_v7 }
0x21e0   :  { %2478 = vrcp.f32 %v1661_v8 }
0x21e1   :  { %2480 = vtanh.f32 %v3250_v38 }
0x21e2   :  { %2482 = vpow2.f32 %v1999_v20 }
0x21ed   :  { %v2479_v9 = vpop.eup %2478 }
0x21ee   :  { %1668 = vrot.lane.b32.xlu0 %v2479_v9, %s2569_s20  ;;  %v2481_v15 = vpop.eup %2480 }
0x21ef   :  { %v2483_v23 = vpop.eup %2482 }
0x21f0   :  { %v1646_v25 = vadd.f32 1.0, %v2483_v23 }
0x21f2   :  { %1553 = vrot.lane.b32.xlu0 %v2481_v15, %s2563_s27  ;;  %2484 = vrcp.f32 %v1646_v25 }
0x21ff   :  { %v2485_v28 = vpop.eup %2484 }
0x2200   :  { %v1665_v33 = vmin.f32 %v2485_v28, %v1664_v47 }
0x2202   :  { %v1666_v34 = vadd.f32 %v1665_v33, %v3209_v48 }
0x2260   :  { %v1669_v45 = vpop.permute.xlu0 %1668 }
0x2261   :  { %vm1671_vm15 = vcmp.gt.f32.partialorder %v1666_v34, %v1669_v45 }
0x2262   :  { %v1672_v10 = vsel %vm1671_vm15, 1, %v2568_v46  ;;  %v3269_v11 = vsel %vm1671_vm15, 0.0, %v1666_v34 }
0x2263   :  { %1674 = vperm.xlu1 %2372, %v1672_v10   ;;  %v1892_v6 = vsub.f32 1.0, %v3269_v11 }
0x2264   :  { %v1554_v12 = vpop.permute.xlu0 %1553 }
0x2265   :  { %v1556_v26 = vmul.f32 %v2475_v52, %v1554_v12 }
0x22de   :  { %v1675_v5 = vpop.permute.xlu1 %1674 }
0x22df   :  { %vm1676_vm4 = vcmp.eq.s32.totalorder %v1675_v5, 1 }
0x22e0   :  { %v3273_v21 = vsel %vm1676_vm4, %v1556_v26, %v3214_v14 }
0x22e1   :  { %1681 = vrot.lane.b32.xlu1 %v3273_v21, %s2564_s28 }
0x2353   :  { %v1682_v22 = vpop.permute.xlu1 %1681 }
0x2354   :  { %1685 = vst.msk [vmem:[#allocation5 + $0xc] sm:$0x3] %vm34_vm0, %v1682_v22  ;;  %2338 = vmatmul.mubr.msk.f32.vlgmr.msra.gmra.mxu0 %vm82_vm2, %v1682_v22 }
0x2355   :  { %2341 = vmatpush3.msra.mxu0 %v3085_v35  ;;  %2356 = vmatprep.mubr.msk.f32.mxu0 %vm2562_vm1, %v2561_v1  ;;  %v2001_v35 = vld [vmem:[%s3341_s0 + $0xe] sm:$0x3]  ;;  %s2571_s0 = smov [#allocation5]  }
0x2356   :  { %2342 = vmatprep.subr.mxu0 %v2561_v1 }
0x2357   :  { %2343 = vmatpush3.msra.mxu0 %v3094_v36 }
0x2358   :  { %2344 = vmatprep.subr.mxu0 %v2561_v1 }
0x2359   :  { %2345 = vmatpush3.msra.mxu0 %v3101_v41 }
0x235a   :  { %2346 = vmatprep.subr.mxu0 %v2561_v1 }
0x235b   :  { %2347 = vmatpush3.msra.mxu0 %v3108_v24 }
0x235c   :  { %2348 = vmatprep.subr.mxu0 %v2561_v1 }
0x235d   :  { %2349 = vmatpush3.msra.mxu0 %v3115_v31 }
0x235e   :  { %2350 = vmatprep.subr.mxu0 %v2561_v1 }
0x235f   :  { %2351 = vmatpush3.msra.mxu0 %v3122_v27  ;;  %v3303_v27 = vsel %vm1676_vm4, %v3250_v38, %v3244_v29 }
0x2360   :  { %2352 = vmatprep.subr.mxu0 %v2561_v1 }
0x2361   :  { %2353 = vmatpush3.msra.mxu0 %v3129_v30 }
0x2362   :  { %2354 = vmatprep.subr.mxu0 %v2561_v1 }
0x2363   :  { %2355 = vmatpush3.msra.mxu0 %v3136_v43 }
0x2414   :  { %v1756_v36 = vpop.f32.mrf.mxu0 }
0x2415   :  { %v1760_v41 = vadd.f32 %v2001_v35, %v1756_v36 }
0x2416   :  { %v2339_v24 = vpop.f32.mrf.mxu0 }
0x2417   :  { %2486 = vtanh.f32 %v1760_v41  ;;  %v2003_v1 = vmul.f32 -1.442695, %v1760_v41 }
0x2419   :  { %2488 = vpow2.f32 %v2003_v1 }
0x2424   :  { %v2487_v31 = vpop.eup %2486 }
0x2425   :  { %1770 = vrot.lane.b32.xlu0 %v2487_v31, %s2563_s27 }
0x2426   :  { %v2489_v30 = vpop.eup %2488 }
0x2427   :  { %v1764_v43 = vadd.f32 1.0, %v2489_v30 }
0x2429   :  { %1786 = vrot.lane.b32.xlu0 %v3303_v27, %s2570_s21  ;;  %2490 = vrcp.f32 %v1764_v43 }
0x2436   :  { %v2491_v48 = vpop.eup %2490 }
0x2437   :  { %v1768_v39 = vmul.f32 %v2491_v48, %v3303_v27 }
0x2497   :  { %v1771_v14 = vpop.permute.xlu0 %1770 }
0x2498   :  { %v1773_v19 = vmul.f32 %v2491_v48, %v1771_v14 }
0x249a   :  { %1775 = vrot.lane.b32.xlu1 %v1773_v19, %s2564_s28 }
0x249b   :  { %v1787_v51 = vpop.permute.xlu0 %1786 }
0x250c   :  { %v1776_v42 = vpop.permute.xlu1 %1775 }
0x250d   :  { %v1778_v16 = vadd.f32 %v1776_v42, %v1768_v39 }
0x250f   :  { %v1789_v29 = vsel %vm82_vm2, %v1787_v51, %v1778_v16  ;;  %2492 = vtanh.f32 %v1778_v16 }
0x2510   :  { %2357 = vmatmul.mubr.msk.f32.vlgmr.msra.gmra.mxu0 %vm186_vm3, %v1789_v29 }
0x251c   :  { %v2493_v2 = vpop.eup %2492 }
0x25d0   :  { %v1859_v52 = vpop.f32.mrf.mxu0 }
0x25d1   :  { %v1860_v44 = vadd.f32 %v3183_v49, %v1859_v52 }
0x25d2   :  { %v2358_v53 = vpop.f32.mrf.mxu0 }
0x25d3   :  { %vm1863_vm1 = vcmp.ge.f32.partialorder %v1860_v44, 0.0  ;;  %v1864_v54 = vmul.f32 0.01, %v1860_v44 }
0x25d5   :  { %v1865_v0 = vsel %vm1863_vm1, %v1860_v44, %v1864_v54 }
0x25d6   :  { %v1877_v38 = vmul.f32 %v1865_v0, %v2764_v37  ;;  %v1866_v13 = vmul.f32 %v3191_v4, %v1865_v0 }
0x25d8   :  { %1879 = vrot.lane.b32.xlu1 %v1877_v38, %s2566_s15  ;;  %v1867_v50 = vsel %vm264_vm5, %v1866_v13, 0.0  ;;  %s2572_s15 = smov [#allocation7]  }
0x25fc   :  { %1868 = vadd.xlane.f32.xlu1 %v1867_v50 }
0x264a   :  { %v1880_v55 = vpop.permute.xlu1 %1879 }
0x264b   :  { %v1882_v56 = vsel %vm264_vm5, %v1880_v55, 0.0 }
0x264c   :  { %1883 = vadd.xlane.f32.xlu0 %v1882_v56 }
0x2662   :  { %1781 = vrot.lane.b32.xlu0 %v2493_v2, %s2563_s27  ;;  %s1931_s27 = sshll.u32 %s2571_s0, 4  ;;  %s1932_s27 = int_to_ptr.vmem [resolvable:$true] %s1931_s27 }
0x2663   :  { %s2517_s25 = scalar_lea.vmem %s1932_s27, 256  ;;  %p2522_p1 = scmp.lt.s32.totalorder %s1932_s27, %s1932_s27 }
0x2664   :  { %p2518_p0 = scmp.ne.s32.totalorder %s1932_s27, %s2517_s25  ;;  %p2523_p2 = scmp.lt.s32.totalorder %s2517_s25, %s2517_s25 }
0x2666   :  { %p2524_p3 = por %p2523_p2, %p2522_p1 }
0x2668   :  { %p2525_p4 = pnand %p2524_p3, %p2518_p0 }
0x2685   :  { %v1869_v32 = vpop.xlane.xlu1 %1868 }
0x2686   :  { %v1870_v59 = vadd.f32 %v3199_v62, %v1869_v32 }
0x2688   :  { %v2005_v60 = vmul.f32 -1.442695, %v1870_v59 }
0x26d5   :  { %v1884_v49 = vpop.xlane.xlu0 %1883 }
0x26d6   :  { %v1885_v3 = vadd.f32 %v3199_v62, %v1884_v49 }
0x26d8   :  { %v2006_v57 = vmul.f32 -1.442695, %v1885_v3 }
0x26d9   :  { %v1782_v62 = vpop.permute.xlu0 %1781 }
0x26da   :  { %2494 = vpow2.f32 %v2006_v57  ;;  %v1784_v18 = vmul.f32 %v2491_v48, %v1782_v62 }
0x26e7   :  { %v2495_v37 = vpop.eup %2494 }
0x26e8   :  { %v1889_v58 = vadd.f32 1.0, %v2495_v37 }
0x26ea   :  { %2496 = vrcp.f32 %v1889_v58 }
0x26eb   :  { %2498 = vpow2.f32 %v2005_v60 }
0x26f7   :  { %v2497_v4 = vpop.eup %2496 }
0x26f8   :  { %1896 = vrot.lane.b32.xlu1 %v2497_v4, %s2569_s20  ;;  %v2499_v61 = vpop.eup %2498  ;;  %s1944_s20 = sshll.u32 %s2572_s15, 4  ;;  %s1945_s20 = int_to_ptr.vmem [resolvable:$true] %s1944_s20 }
0x26f9   :  { %v1874_v40 = vadd.f32 1.0, %v2499_v61 }
0x26fb   :  { %2500 = vrcp.f32 %v1874_v40 }
0x2708   :  { %v2501_v63 = vpop.eup %2500 }
0x2709   :  { %v1893_v7 = vmin.f32 %v2501_v63, %v1892_v6 }
0x270b   :  { %v1894_v8 = vadd.f32 %v1893_v7, %v3269_v11 }
0x276a   :  { %v1897_v9 = vpop.permute.xlu1 %1896 }
0x276b   :  { %vm1899_vm2 = vcmp.gt.f32.partialorder %v1894_v8, %v1897_v9 }
0x276c   :  { %v1900_v15 = vsel %vm1899_vm2, 1, %v2568_v46  ;;  %v1907_v17 = vsel %vm1899_vm2, 0.0, %v1894_v8 }
0x276d   :  { %1921 = vst.msk [vmem:[#allocation4] sm:$0x3] %vm37_vm6, %v1907_v17  ;;  %1902 = vperm.xlu0 %2373, %v1900_v15  }
0x27e8   :  { %v1903_v20 = vpop.permute.xlu0 %1902 }
0x27e9   :  { %vm1904_vm3 = vcmp.eq.s32.totalorder %v1903_v20, 1 }
0x27ea   :  { %v1905_v23 = vsel %vm1904_vm3, %v1784_v18, %v3273_v21  ;;  %v1906_v25 = vsel %vm1904_vm3, %v1778_v16, %v3303_v27 }
0x27eb   :  { %1909 = vrot.lane.b32.xlu1 %v1905_v23, %s2564_s28 }
0x27ef   :  { %1916 = vrot.lane.b32.xlu1 %v1906_v25, %s2570_s21 }
0x285d   :  { %v1910_v46 = vpop.permute.xlu1 %1909 }
0x285e   :  { %1913 = vst.msk [vmem:[#allocation5 + $0xe] sm:$0x3] %vm34_vm0, %v1910_v46  ;;  %1914 = vst.msk [vmem:[#allocation2] sm:$0x3] %vm34_vm0, %v1910_v46 }
0x285f   :  { %2528 = shalt.err (!%p2525_p4)
}
0x2860   :  { %s2573_s26 = smov 2   ;;  %s2537_s30 = scalar_lea.vmem %s1945_s20, 32 }
0x2861   :  { %1937 = dma.vmem_to_hbm [thread:$0]  %s1932_s27, 256, %s3348_s7, [#allocation6], %s2564_s28, %s2564_s28, %s2573_s26   ;;  %v1917_v28 = vpop.permute.xlu1 %1916 }
0x2862   :  { %1919 = vst.msk [vmem:[#allocation3] sm:$0x3] %vm34_vm0, %v1917_v28  ;;  %1925 = vst.msk [vmem:[#allocation7] sm:$0x3] %vm34_vm0, %v1917_v28  ;;  %p2538_p5 = scmp.ne.s32.totalorder %s1945_s20, %s2537_s30  ;;  %p2542_p6 = scmp.lt.s32.totalorder %s1945_s20, %s1945_s20 }
0x2863   :  { %p2543_p7 = scmp.lt.s32.totalorder %s2537_s30, %s2537_s30 }
0x2865   :  { %p2544_p8 = por %p2543_p7, %p2542_p6 }
0x2867   :  { %p2545_p9 = pnand %p2544_p8, %p2538_p5 }
0x2869   :  { %2548 = shalt.err (!%p2545_p9)
}
0x286a   :  { %1947 = dma.vmem_to_hbm [thread:$0]  %s1945_s20, 32, %s3349_s8, [#allocation8]  }
0x286b   :  { %2557 = dma.done.wait [#allocation6], 256  }
0x286c   :  { %2558 = vsyncadd [#allocation6], 4294967040 }
0x286d   :  { %2559 = dma.done.wait [#allocation8], 32  }
0x286e   :  { %2560 = vsyncadd [#allocation8], 4294967264 }
0x286f   :  { %1954 = vsyncpa [#allocation6], 1 }
0x2870   :  { %1955 = vsyncpa [#allocation8], 1 }

</bundles_post_ra>
